<compile_context>
chip_gen: v7x
topology: tpu7x:2x2x1
jax: 0.10.0
libtpu: 0.0.40
codegen_flags: <defaults>
</compile_context>

<pallas_src>
import functools

import jax
import jax.numpy as jnp
from jax import lax
from jax.experimental import pallas as pl
from jax.experimental.pallas import tpu as pltpu


def _round_up(x, m):
    return ((x + m - 1) // m) * m


def _vq_kernel(m_ref, x_ref, emb_ref, esq_ref,
               q_ref, idx_ref, counts_ref, sse_ref):
    """One row tile: nearest-codebook lookup + per-tile partial reductions.

    m_ref     : SMEM (1,) int32   -- number of valid (un-padded) rows overall
    x_ref     : (tm, D)  f32      -- flattened input rows (zero-padded tail)
    emb_ref   : (Kp, D)  f32      -- codebook, rows zero-padded to Kp
    esq_ref   : (1, Kp)  f32      -- ||e||^2 per code, big sentinel on pad rows
    q_ref     : (tm, D)  f32      -- quantized rows                      (out)
    idx_ref   : (tm, 1)  int32    -- nearest-code index per row          (out)
    counts_ref: (1, 1, Kp) f32    -- per-tile code counts (valid rows)   (out)
    sse_ref   : (1, 1, 1)  f32    -- per-tile sum((q-x)^2) (valid rows)  (out)
    """
    x = x_ref[...]                        # (tm, D)  f32
    emb = emb_ref[...]                    # (Kp, D)  f32
    esq = esq_ref[...]                    # (1, Kp)  f32

    tm = x.shape[0]
    kp = emb.shape[0]

    # Distance cross-term on the MXU: bf16 inputs, f32 accumulation.
    # ||x||^2 is constant per row so it cannot change the argmin and is
    # dropped. (bf16 rounding could flip pathological exact-tie cases.)
    xe = lax.dot_general(
        x.astype(jnp.bfloat16), emb.astype(jnp.bfloat16),
        dimension_numbers=(((1,), (1,)), ((), ())),
        preferred_element_type=jnp.float32)            # (tm, Kp)
    score = esq - 2.0 * xe                             # (tm, Kp)

    # argmin along Kp with first-occurrence tie-break (matches torch.argmin).
    min_val = jnp.min(score, axis=1, keepdims=True)    # (tm, 1)
    col = lax.broadcasted_iota(jnp.int32, (tm, kp), 1)
    idx = jnp.min(jnp.where(score == min_val, col, kp),
                  axis=1, keepdims=True)               # (tm, 1) int32
    idx_ref[...] = idx

    # One-hot (f32) + codebook gather via MXU (pad codes are never selected,
    # so their zero rows contribute nothing).
    enc = (col == idx).astype(jnp.float32)                        # (tm, Kp)
    q = jnp.dot(enc, emb, preferred_element_type=jnp.float32)     # (tm, D)
    q_ref[...] = q

    # Valid-row mask for the padded tail tile.
    row = pl.program_id(0) * tm + lax.broadcasted_iota(jnp.int32, (tm, 1), 0)
    valid = (row < m_ref[0]).astype(jnp.float32)                  # (tm, 1)

    # Per-tile partial reductions (replace the full (M, K) encodings output
    # and the wrapper-side extra pass over quantized/inputs).
    counts = jnp.sum(enc * valid, axis=0, keepdims=True)          # (1, Kp)
    counts_ref[...] = counts.reshape(1, 1, kp)

    diff = (q - x) * valid
    sse_ref[...] = jnp.sum(diff * diff).reshape(1, 1, 1)


def vq_lookup(flat_input, embedding, *, tm=512):
    """flat_input (M, D), embedding (K, D) ->
       (quantized (M, D) f32, indices (M, 1) i32, counts (G,1,Kp), sse (G,1,1))."""
    m, d = flat_input.shape
    k, d2 = embedding.shape
    assert d == d2

    tm = min(tm, _round_up(m, 8))          # small-M: one (or few) tiles
    m_pad = _round_up(m, tm)
    k_pad = _round_up(k, 128)              # lane-dense K
    grid_m = m_pad // tm

    x = jnp.pad(flat_input.astype(jnp.float32), ((0, m_pad - m), (0, 0)))
    emb = jnp.pad(embedding.astype(jnp.float32), ((0, k_pad - k), (0, 0)))

    # Hoisted codebook norms; pad codes get a huge sentinel so they never win.
    e_sq = jnp.sum(emb * emb, axis=1)
    e_sq = jnp.where(jnp.arange(k_pad) < k, e_sq,
                     jnp.float32(1e30)).reshape(1, k_pad)

    m_scalar = jnp.array([m], dtype=jnp.int32)

    q, idx, counts, sse = pl.pallas_call(
        _vq_kernel,
        out_shape=(
            jax.ShapeDtypeStruct((m_pad, d), jnp.float32),
            jax.ShapeDtypeStruct((m_pad, 1), jnp.int32),
            jax.ShapeDtypeStruct((grid_m, 1, k_pad), jnp.float32),
            jax.ShapeDtypeStruct((grid_m, 1, 1), jnp.float32),
        ),
        grid_spec=pltpu.PrefetchScalarGridSpec(
            num_scalar_prefetch=1,
            grid=(grid_m,),
            in_specs=[
                pl.BlockSpec((tm, d), lambda i, m_ref: (i, 0)),      # row tile
                pl.BlockSpec((k_pad, d), lambda i, m_ref: (0, 0)),   # codebook
                pl.BlockSpec((1, k_pad), lambda i, m_ref: (0, 0)),   # ||e||^2
            ],
            out_specs=[
                pl.BlockSpec((tm, d), lambda i, m_ref: (i, 0)),
                pl.BlockSpec((tm, 1), lambda i, m_ref: (i, 0)),
                pl.BlockSpec((1, 1, k_pad), lambda i, m_ref: (i, 0, 0)),
                pl.BlockSpec((1, 1, 1), lambda i, m_ref: (i, 0, 0)),
            ],
        ),
        compiler_params=pltpu.CompilerParams(
            dimension_semantics=("parallel",),          # shards rows across TCs
            vmem_limit_bytes=64 * 1024 * 1024,          # allow big row tiles
        ),
    )(m_scalar, x, emb, e_sq)

    return q[:m], idx[:m], counts, sse


@functools.partial(jax.jit, static_argnames=("commitment_cost",))
def vector_quantizer_forward(x_nchw, embedding, commitment_cost=0.25):
    """Forward pass matching VectorQuantizer.forward (forward values only)."""
    n, c, h, w = x_nchw.shape
    k, d = embedding.shape
    assert c == d, "channel dim must equal embedding_dim"

    # NCHW -> NHWC -> (M, D)
    inputs_nhwc = jnp.transpose(x_nchw, (0, 2, 3, 1)).astype(jnp.float32)
    flat_input = inputs_nhwc.reshape(-1, d)
    m = flat_input.shape[0]

    q_flat, idx, counts, sse = vq_lookup(flat_input, embedding)
    quantized_nhwc = q_flat.reshape(inputs_nhwc.shape)

    # MSE from in-kernel partial SSE; e_latent_loss == q_latent_loss in value.
    mse = jnp.sum(sse) / jnp.float32(m * d)
    loss = mse + commitment_cost * mse

    # Straight-through estimator: forward value equals quantized.
    # TODO(synk): straight-through / .detach() gradient routing is a
    # training-time autodiff concern, not part of the forward kernel.
    quantized_st = inputs_nhwc + (quantized_nhwc - inputs_nhwc)

    # Perplexity from in-kernel per-tile code counts (valid rows only).
    avg_probs = jnp.sum(counts, axis=(0, 1))[:k] / jnp.float32(m)
    perplexity = jnp.exp(-jnp.sum(avg_probs * jnp.log(avg_probs + 1e-10)))

    # The module returns one-hot encodings; rebuild them cheaply from indices.
    encodings = (idx == jnp.arange(k, dtype=jnp.int32)[None, :]).astype(jnp.float32)

    quantized_out = jnp.transpose(quantized_st, (0, 3, 1, 2))   # back to NCHW
    return loss, quantized_out, perplexity, encodings


if __name__ == "__main__":
    num_embeddings = 16
    embedding_dim = 8
    commitment_cost = 0.25

    key = jax.random.PRNGKey(0)
    k_emb, k_x = jax.random.split(key)

    # Deterministic "nn.Embedding" init: uniform(-1/K, 1/K), shape (K, D).
    embedding = jax.random.uniform(
        k_emb, (num_embeddings, embedding_dim),
        minval=-1.0 / num_embeddings, maxval=1.0 / num_embeddings,
        dtype=jnp.float32,
    )

    # Small NCHW input: batch=2, channels=embedding_dim=8, spatial=8x8 -> M=128.
    x = jax.random.normal(k_x, (2, embedding_dim, 8, 8), dtype=jnp.float32)

    loss, quantized, perplexity, encodings = vector_quantizer_forward(
        x, embedding, commitment_cost=commitment_cost
    )
    jax.block_until_ready((loss, quantized, perplexity, encodings))

    assert quantized.shape == x.shape
    assert encodings.shape == (2 * 8 * 8, num_embeddings)
    assert loss.shape == () and perplexity.shape == ()
    # encodings must be exact one-hot rows
    assert float(jnp.sum(encodings)) == float(2 * 8 * 8)

    print("KERNEL_OK")
</pallas_src>

<mosaic_0001>
module attributes {stable_mosaic.version = 11 : i64} {
  func.func @_vq_kernel(%arg0: i32, %arg1: memref<1xi32, #tpu.memory_space<smem>>, %arg2: memref<128x8xf32, #tpu.memory_space<vmem>>, %arg3: memref<128x8xf32, #tpu.memory_space<vmem>>, %arg4: memref<1x128xf32, #tpu.memory_space<vmem>>, %arg5: memref<128x8xf32, #tpu.memory_space<vmem>>, %arg6: memref<128x1xi32, #tpu.memory_space<vmem>>, %arg7: memref<1x1x128xf32, #tpu.memory_space<vmem>>, %arg8: memref<1x1x1xf32, #tpu.memory_space<vmem>>) attributes {dimension_semantics = [#tpu.dimension_semantics<parallel>], iteration_bounds = array<i64: 1>, scalar_prefetch = 1 : i64, scratch_operands = 0 : i64, tpu.core_type = #tpu.core_type<tc>, window_params = [{transform_indices = @transform_0, window_bounds = array<i64: 128, 8>}, {pipeline_mode = #tpu.pipeline_mode<synchronous>, transform_indices = @transform_1, window_bounds = array<i64: 128, 8>}, {pipeline_mode = #tpu.pipeline_mode<synchronous>, transform_indices = @transform_2, window_bounds = array<i64: 1, 128>}, {transform_indices = @transform_3, window_bounds = array<i64: 128, 8>}, {transform_indices = @transform_4, window_bounds = array<i64: 128, 1>}, {transform_indices = @transform_5, window_bounds = array<i64: 1, 1, 128>}, {transform_indices = @transform_6, window_bounds = array<i64: 1, 1, 1>}]} {
    %c0 = arith.constant 0 : index
    %c0_0 = arith.constant 0 : index
    %0 = vector.load %arg2[%c0, %c0_0] : memref<128x8xf32, #tpu.memory_space<vmem>>, vector<128x8xf32>
    %c0_1 = arith.constant 0 : index
    %c0_2 = arith.constant 0 : index
    %1 = vector.load %arg3[%c0_1, %c0_2] : memref<128x8xf32, #tpu.memory_space<vmem>>, vector<128x8xf32>
    %c0_3 = arith.constant 0 : index
    %c0_4 = arith.constant 0 : index
    %2 = vector.load %arg4[%c0_3, %c0_4] : memref<1x128xf32, #tpu.memory_space<vmem>>, vector<1x128xf32>
    %3 = arith.truncf %0 : vector<128x8xf32> to vector<128x8xbf16>
    %4 = arith.truncf %1 : vector<128x8xf32> to vector<128x8xbf16>
    %cst = arith.constant dense<0.000000e+00> : vector<128x128xf32>
    %5 = tpu.matmul %3, %4, %cst {dimension_numbers = #tpu.dot_dimension_numbers<[1], [1], [0], [0], [0, 0, 1, 0], [], []>} : vector<128x8xbf16>, vector<128x8xbf16>, vector<128x128xf32> -> vector<128x128xf32>
    %cst_5 = arith.constant 2.000000e+00 : f32
    %6 = vector.broadcast %cst_5 : f32 to vector<128x128xf32>
    %7 = arith.mulf %6, %5 : vector<128x128xf32>
    %8 = vector.broadcast %2 : vector<1x128xf32> to vector<128x128xf32>
    %9 = arith.subf %8, %7 : vector<128x128xf32>
    %cst_6 = arith.constant dense<0x7F800000> : vector<128xf32>
    %10 = vector.multi_reduction <minimumf>, %9, %cst_6 [1] : vector<128x128xf32> to vector<128xf32>
    %11 = vector.shape_cast %10 : vector<128xf32> to vector<128x1xf32>
    %12 = tpu.iota {dimensions = array<i32: 1>} : vector<128x128xi32>
    %13 = vector.broadcast %11 : vector<128x1xf32> to vector<128x128xf32>
    %14 = arith.cmpf oeq, %9, %13 : vector<128x128xf32>
    %c128_i32 = arith.constant 128 : i32
    %15 = vector.broadcast %c128_i32 : i32 to vector<128x128xi32>
    %16 = arith.select %14, %12, %15 : vector<128x128xi1>, vector<128x128xi32>
    %cst_7 = arith.constant dense<2147483647> : vector<128xi32>
    %17 = vector.multi_reduction <minsi>, %16, %cst_7 [1] : vector<128x128xi32> to vector<128xi32>
    %18 = vector.shape_cast %17 : vector<128xi32> to vector<128x1xi32>
    %c0_8 = arith.constant 0 : index
    %c0_9 = arith.constant 0 : index
    %19 = vector.load %arg6[%c0_8, %c0_9] : memref<128x1xi32, #tpu.memory_space<vmem>>, vector<128x1xi32>
    tpu.vector_store %arg6[%c0_8, %c0_9], %18 {strides = array<i32>} : memref<128x1xi32, #tpu.memory_space<vmem>>, vector<128x1xi32>,
    %20 = vector.broadcast %18 : vector<128x1xi32> to vector<128x128xi32>
    %21 = arith.cmpi eq, %12, %20 : vector<128x128xi32>
    %22 = arith.extui %21 : vector<128x128xi1> to vector<128x128xi32>
    %23 = arith.sitofp %22 : vector<128x128xi32> to vector<128x128xf32>
    %cst_10 = arith.constant dense<0.000000e+00> : vector<128x8xf32>
    %24 = tpu.matmul %23, %1, %cst_10 {dimension_numbers = #tpu.dot_dimension_numbers<[1], [0], [0], [1], [0, 0, 1, 1], [], []>} : vector<128x128xf32>, vector<128x8xf32>, vector<128x8xf32> -> vector<128x8xf32>
    %c0_11 = arith.constant 0 : index
    %c0_12 = arith.constant 0 : index
    %25 = vector.load %arg5[%c0_11, %c0_12] : memref<128x8xf32, #tpu.memory_space<vmem>>, vector<128x8xf32>
    tpu.vector_store %arg5[%c0_11, %c0_12], %24 {strides = array<i32>} : memref<128x8xf32, #tpu.memory_space<vmem>>, vector<128x8xf32>,
    %c128_i32_13 = arith.constant 128 : i32
    %26 = arith.muli %arg0, %c128_i32_13 : i32
    %27 = tpu.iota {dimensions = array<i32: 0>} : vector<128x1xi32>
    %28 = vector.broadcast %26 : i32 to vector<128x1xi32>
    %29 = arith.addi %28, %27 : vector<128x1xi32>
    %c0_14 = arith.constant 0 : index
    %30 = memref.load %arg1[%c0_14] : memref<1xi32, #tpu.memory_space<smem>>
    %31 = vector.broadcast %30 : i32 to vector<128x1xi32>
    %32 = arith.cmpi slt, %29, %31 : vector<128x1xi32>
    %33 = arith.extui %32 : vector<128x1xi1> to vector<128x1xi32>
    %34 = arith.sitofp %33 : vector<128x1xi32> to vector<128x1xf32>
    %35 = vector.broadcast %34 : vector<128x1xf32> to vector<128x128xf32>
    %36 = arith.mulf %23, %35 : vector<128x128xf32>
    %cst_15 = arith.constant dense<0.000000e+00> : vector<128xf32>
    %37 = vector.multi_reduction <add>, %36, %cst_15 [0] : vector<128x128xf32> to vector<128xf32>
    %38 = vector.shape_cast %37 : vector<128xf32> to vector<1x128xf32>
    %39 = vector.shape_cast %38 : vector<1x128xf32> to vector<1x1x128xf32>
    %c0_16 = arith.constant 0 : index
    %c0_17 = arith.constant 0 : index
    %c0_18 = arith.constant 0 : index
    %40 = vector.load %arg7[%c0_16, %c0_17, %c0_18] : memref<1x1x128xf32, #tpu.memory_space<vmem>>, vector<1x1x128xf32>
    tpu.vector_store %arg7[%c0_16, %c0_17, %c0_18], %39 {strides = array<i32>} : memref<1x1x128xf32, #tpu.memory_space<vmem>>, vector<1x1x128xf32>,
    %41 = arith.subf %24, %0 : vector<128x8xf32>
    %42 = vector.broadcast %34 : vector<128x1xf32> to vector<128x8xf32>
    %43 = arith.mulf %41, %42 : vector<128x8xf32>
    %44 = arith.mulf %43, %43 : vector<128x8xf32>
    %45 = vector.shape_cast %44 : vector<128x8xf32> to vector<1x128x8xf32>
    %cst_19 = arith.constant dense<0.000000e+00> : vector<1xf32>
    %46 = vector.multi_reduction <add>, %45, %cst_19 [1, 2] : vector<1x128x8xf32> to vector<1xf32>
    %47 = vector.shape_cast %46 : vector<1xf32> to vector<1x1x1xf32>
    %48 = vector.extract %47[0, 0, 0] : f32 from vector<1x1x1xf32>
    %49 = vector.broadcast %48 : f32 to vector<1x1x1xf32>
    %c0_20 = arith.constant 0 : index
    %c0_21 = arith.constant 0 : index
    %c0_22 = arith.constant 0 : index
    %50 = vector.load %arg8[%c0_20, %c0_21, %c0_22] : memref<1x1x1xf32, #tpu.memory_space<vmem>>, vector<1x1x1xf32>
    tpu.vector_store %arg8[%c0_20, %c0_21, %c0_22], %49 {strides = array<i32>} : memref<1x1x1xf32, #tpu.memory_space<vmem>>, vector<1x1x1xf32>,
    return
  }
  func.func @transform_0(%arg0: i32, %arg1: memref<1xi32, #tpu.memory_space<smem>>) -> (i32, i32) {
    %c0_i32 = arith.constant 0 : i32
    %c0_i32_0 = arith.constant 0 : i32
    return %arg0, %c0_i32 : i32, i32
  }
  func.func @transform_1(%arg0: i32, %arg1: memref<1xi32, #tpu.memory_space<smem>>) -> (i32, i32) {
    %c0_i32 = arith.constant 0 : i32
    %c0_i32_0 = arith.constant 0 : i32
    %c0_i32_1 = arith.constant 0 : i32
    return %c0_i32, %c0_i32_0 : i32, i32
  }
  func.func @transform_2(%arg0: i32, %arg1: memref<1xi32, #tpu.memory_space<smem>>) -> (i32, i32) {
    %c0_i32 = arith.constant 0 : i32
    %c0_i32_0 = arith.constant 0 : i32
    %c0_i32_1 = arith.constant 0 : i32
    return %c0_i32, %c0_i32_0 : i32, i32
  }
  func.func @transform_3(%arg0: i32, %arg1: memref<1xi32, #tpu.memory_space<smem>>) -> (i32, i32) {
    %c0_i32 = arith.constant 0 : i32
    %c0_i32_0 = arith.constant 0 : i32
    return %arg0, %c0_i32 : i32, i32
  }
  func.func @transform_4(%arg0: i32, %arg1: memref<1xi32, #tpu.memory_space<smem>>) -> (i32, i32) {
    %c0_i32 = arith.constant 0 : i32
    %c0_i32_0 = arith.constant 0 : i32
    return %arg0, %c0_i32 : i32, i32
  }
  func.func @transform_5(%arg0: i32, %arg1: memref<1xi32, #tpu.memory_space<smem>>) -> (i32, i32, i32) {
    %c0_i32 = arith.constant 0 : i32
    %c0_i32_0 = arith.constant 0 : i32
    %c0_i32_1 = arith.constant 0 : i32
    return %arg0, %c0_i32, %c0_i32_0 : i32, i32, i32
  }
  func.func @transform_6(%arg0: i32, %arg1: memref<1xi32, #tpu.memory_space<smem>>) -> (i32, i32, i32) {
    %c0_i32 = arith.constant 0 : i32
    %c0_i32_0 = arith.constant 0 : i32
    %c0_i32_1 = arith.constant 0 : i32
    return %arg0, %c0_i32, %c0_i32_0 : i32, i32, i32
  }
}

</mosaic_0001>

<bundles_post_ra>
// kernel: vector_quantizer_forward.1
= control target key start
LH: loop header
LB: loop body
LE: loop exit
PB: predicated region body
PF: predicated region fallthrough
CT: control target
= control target key end

     0   :  { %14 = vsyncpa [#allocation5], 0  ;;  %s2242_s0 = inlined_call_operand.<no memory space> [shape: s32[1], index: 0, kind: input, shape index: {}]   ;;  %s2243_s1 = inlined_call_operand.hbm [shape: f32[128,8], index: 1, kind: input, shape index: {}]   ;;  %s2244_s2 = inlined_call_operand.hbm [shape: f32[128,8], index: 2, kind: input, shape index: {}]   ;;  %s2245_s3 = inlined_call_operand.hbm [shape: f32[1,128], index: 3, kind: input, shape index: {}]   ;;  %s2246_s4 = inlined_call_operand.hbm [shape: f32[128,8], index: 4, kind: output, shape index: {0}]   ;;  %s2247_s5 = inlined_call_operand.hbm [shape: s32[128,1], index: 5, kind: output, shape index: {1}]   ;;  %s2248_s6 = inlined_call_operand.hbm [shape: f32[1,1,128], index: 6, kind: output, shape index: {2}]   ;;  %s2249_s7 = inlined_call_operand.hbm [shape: f32[1,1,1], index: 7, kind: output, shape index: {3}]  }
   0x1   :  { %15 = vsyncpa [#allocation8], 0 }
   0x2   :  { %16 = vsyncpa [#allocation6], 0 }
   0x3   :  { %17 = vsyncpa [#allocation12], 0 }
   0x4   :  { %18 = vsyncpa [#allocation15], 0  ;;  %s1513_s24 = smov [#allocation7]   ;;  %s1514_s26 = smov [#allocation4]  }
   0x5   :  { %s36_s25 = sshll.u32 %s1513_s24, 4  ;;  %s24_s27 = sshll.u32 %s1514_s26, 4  ;;  %s37_s25 = int_to_ptr.vmem [resolvable:$true] %s36_s25  ;;  %s1564_s27 = int_to_ptr.vmem [resolvable:$true] %s24_s27 }
   0x6   :  { %s1349_s30 = scalar_lea.hbm %s2244_s2, 2048 }
   0x7   :  { %p1350_p0 = scmp.ne.s32.totalorder %s2244_s2, %s1349_s30  ;;  %p1353_p1 = scmp.lt.u32.totalorder %s1349_s30, %s2244_s2 }
   0x9   :  { %p1355_p2 = pnand %p1353_p1, %p1350_p0 }
   0xb   :  { %1358 = shalt.err (!%p1355_p2)
}
   0xc   :  { %s1359_s12 = scalar_lea.vmem %s37_s25, 2048  ;;  %p1364_p4 = scmp.lt.s32.totalorder %s37_s25, %s37_s25 }
   0xd   :  { %p1360_p3 = scmp.ne.s32.totalorder %s37_s25, %s1359_s12  ;;  %p1365_p5 = scmp.lt.s32.totalorder %s1359_s12, %s1359_s12 }
   0xf   :  { %p1366_p6 = por %p1365_p5, %p1364_p4 }
  0x11   :  { %p1367_p7 = pnand %p1366_p6, %p1360_p3 }
  0x13   :  { %1370 = shalt.err (!%p1367_p7)
}
  0x14   :  { %s1515_s13 = smov 128   ;;  %s1516_s14 = smov 8  }
  0x15   :  { %42 = dma.hbm_to_vmem [thread:$0]  %s2244_s2, 2048, %s37_s25, [#allocation8], %s1515_s13, %s1515_s13, %s1516_s14  }
  0x16   :  { %s1371_s19 = scalar_lea.hbm %s2243_s1, 2048 }
  0x17   :  { %p1372_p8 = scmp.ne.s32.totalorder %s2243_s1, %s1371_s19  ;;  %p1375_p9 = scmp.lt.u32.totalorder %s1371_s19, %s2243_s1 }
  0x19   :  { %p1377_p10 = pnand %p1375_p9, %p1372_p8 }
  0x1b   :  { %1380 = shalt.err (!%p1377_p10)
}
  0x1c   :  { %s1381_s24 = scalar_lea.vmem %s1564_s27, 2048  ;;  %p1386_p12 = scmp.lt.s32.totalorder %s1564_s27, %s1564_s27 }
  0x1d   :  { %p1382_p11 = scmp.ne.s32.totalorder %s1564_s27, %s1381_s24  ;;  %p1387_p13 = scmp.lt.s32.totalorder %s1381_s24, %s1381_s24 }
  0x1f   :  { %p1388_p0 = por %p1387_p13, %p1386_p12 }
  0x21   :  { %p1389_p1 = pnand %p1388_p0, %p1382_p11 }
  0x23   :  { %1392 = shalt.err (!%p1389_p1)
}
  0x24   :  { %30 = dma.hbm_to_vmem [thread:$0]  %s2243_s1, 2048, %s1564_s27, [#allocation5], %s1515_s13, %s1515_s13, %s1516_s14  }
  0x25   :  { %s1517_s26 = smov [#allocation9]   ;;  %s1393_s8 = scalar_lea.hbm %s2245_s3, 16 }
  0x26   :  { %s49_s28 = sshll.u32 %s1517_s26, 4  ;;  %p1394_p2 = scmp.ne.s32.totalorder %s2245_s3, %s1393_s8  ;;  %s50_s28 = int_to_ptr.vmem [resolvable:$true] %s49_s28 }
  0x27   :  { %p1397_p3 = scmp.lt.u32.totalorder %s1393_s8, %s2245_s3 }
  0x29   :  { %p1399_p4 = pnand %p1397_p3, %p1394_p2 }
  0x2b   :  { %1402 = shalt.err (!%p1399_p4)
}
  0x2c   :  { %s1403_s15 = scalar_lea.vmem %s50_s28, 16  ;;  %s1407_s1 = scalar_lea.vmem %s50_s28, 32 }
  0x2d   :  { %p1404_p5 = scmp.ne.s32.totalorder %s50_s28, %s1403_s15  ;;  %p1408_p6 = scmp.lt.s32.totalorder %s50_s28, %s50_s28 }
  0x2e   :  { %p1409_p7 = scmp.lt.s32.totalorder %s1407_s1, %s1403_s15 }
  0x30   :  { %p1410_p8 = por %p1409_p7, %p1408_p6 }
  0x32   :  { %p1411_p9 = pnand %p1410_p8, %p1404_p5 }
  0x34   :  { %1414 = shalt.err (!%p1411_p9)
}
  0x35   :  { %52 = dma.hbm_to_vmem [thread:$0]  %s2245_s3, 16, %s50_s28, [#allocation8]  }
  0x36   :  { %1503 = dma.done.wait [#allocation5], 2048  }
  0x37   :  { %1504 = vsyncadd [#allocation5], 4294965248 }
  0x38   :  { %1505 = dma.done.wait [#allocation8], 2064  }
  0x39   :  { %1506 = vsyncadd [#allocation8], 4294965232  ;;  %v79_v0 = vld [vmem:[#allocation7] sm:$0xff]  ;;  %v80_v1 = vld [vmem:[#allocation7 + $0x8] sm:$0xff]  ;;  %vm112_vm0 = vcmask 64512   ;;  %s1521_s19 = smov [#allocation10]  }
  0x3a   :  { %v81_v2 = vld [vmem:[#allocation7 + $0x10] sm:$0xff]  ;;  %v104_v3 = vpack.c.bf16 %v80_v1, %v79_v0  ;;  %v82_v4 = vld [vmem:[#allocation7 + $0x18] sm:$0xff]  ;;  %v83_v7 = vld [vmem:[#allocation7 + $0x20] sm:$0xff]  ;;  %s1031_s20 = sshll.u32 %s1521_s19, 4  ;;  %s1032_s20 = int_to_ptr.vmem [resolvable:$true] %s1031_s20 }
  0x3b   :  { %v105_v5 = vpack.c.bf16 %v82_v4, %v81_v2  ;;  %v84_v8 = vld [vmem:[#allocation7 + $0x28] sm:$0xff]  ;;  %v63_v9 = vld [vmem:[#allocation4] sm:$0xff]  ;;  %v85_v13 = vld [vmem:[#allocation7 + $0x30] sm:$0xff] }
  0x3c   :  { %1312 = vmatprep.subr.msk.bf16.mxu0 %vm112_vm0, %v104_v3  ;;  %v138_v6 = vsel %vm112_vm0, %v104_v3, 0  ;;  %1281 = vmatprep.subr.bf16.mxu1 %v104_v3  ;;  %v64_v10 = vld [vmem:[#allocation4 + $0x8] sm:$0xff]  ;;  %v106_v12 = vpack.c.bf16 %v84_v8, %v83_v7  ;;  %v86_v14 = vld [vmem:[#allocation7 + $0x38] sm:$0xff]  ;;  %v87_v17 = vld [vmem:[#allocation7 + $0x40] sm:$0xff] }
  0x3d   :  { %1193 = vmatpush3.bf16.xpose.msra.mxu0 %v138_v6  ;;  %1283 = vmatpush3.bf16.msra.mxu1 %v104_v3  ;;  %v96_v11 = vpack.c.bf16 %v64_v10, %v63_v9  ;;  %v141_v15 = vsel %vm112_vm0, %v105_v5, 0  ;;  %v107_v16 = vpack.c.bf16 %v86_v14, %v85_v13  ;;  %v88_v18 = vld [vmem:[#allocation7 + $0x48] sm:$0xff]  ;;  %v89_v20 = vld [vmem:[#allocation7 + $0x50] sm:$0xff]  ;;  %v90_v21 = vld [vmem:[#allocation7 + $0x58] sm:$0xff] }
  0x3e   :  { %1313 = vmatprep.subr.msk.bf16.mxu0 %vm112_vm0, %v105_v5  ;;  %1285 = vmatprep.subr.bf16.mxu1 %v105_v5  ;;  %v108_v19 = vpack.c.bf16 %v88_v18, %v87_v17  ;;  %v144_v22 = vsel %vm112_vm0, %v106_v12, 0  ;;  %v109_v23 = vpack.c.bf16 %v90_v21, %v89_v20  ;;  %v91_v24 = vld [vmem:[#allocation7 + $0x60] sm:$0xff]  ;;  %v92_v25 = vld [vmem:[#allocation7 + $0x68] sm:$0xff]  ;;  %v93_v27 = vld [vmem:[#allocation7 + $0x70] sm:$0xff] }
  0x3f   :  { %1208 = vmatprep.mubr.msk.bf16.mxu0 %vm112_vm0, %v96_v11  ;;  %v110_v26 = vpack.c.bf16 %v92_v25, %v91_v24  ;;  %v94_v28 = vld [vmem:[#allocation7 + $0x78] sm:$0xff]  ;;  %v147_v29 = vsel %vm112_vm0, %v107_v16, 0  ;;  %v65_v35 = vld [vmem:[#allocation4 + $0x10] sm:$0xff]  ;;  %v67_v37 = vld [vmem:[#allocation4 + $0x20] sm:$0xff] }
  0x40   :  { %v111_v30 = vpack.c.bf16 %v94_v28, %v93_v27  ;;  %v150_v31 = vsel %vm112_vm0, %v108_v19, 0  ;;  %v153_v32 = vsel %vm112_vm0, %v109_v23, 0  ;;  %v66_v36 = vld [vmem:[#allocation4 + $0x18] sm:$0xff]  ;;  %v68_v38 = vld [vmem:[#allocation4 + $0x28] sm:$0xff]  ;;  %v69_v41 = vld [vmem:[#allocation4 + $0x30] sm:$0xff] }
  0x41   :  { %1287 = vmatpush3.bf16.msra.mxu1 %v105_v5  ;;  %v156_v33 = vsel %vm112_vm0, %v110_v26, 0  ;;  %v97_v39 = vpack.c.bf16 %v66_v36, %v65_v35  ;;  %v98_v40 = vpack.c.bf16 %v68_v38, %v67_v37  ;;  %v70_v42 = vld [vmem:[#allocation4 + $0x38] sm:$0xff]  ;;  %v71_v43 = vld [vmem:[#allocation4 + $0x40] sm:$0xff]  ;;  %v72_v44 = vld [vmem:[#allocation4 + $0x48] sm:$0xff] }
  0x42   :  { %1289 = vmatprep.subr.bf16.mxu1 %v106_v12  ;;  %v159_v34 = vsel %vm112_vm0, %v111_v30, 0  ;;  %v99_v45 = vpack.c.bf16 %v70_v42, %v69_v41  ;;  %v100_v46 = vpack.c.bf16 %v72_v44, %v71_v43  ;;  %v73_v47 = vld [vmem:[#allocation4 + $0x50] sm:$0xff]  ;;  %v74_v48 = vld [vmem:[#allocation4 + $0x58] sm:$0xff]  ;;  %v75_v49 = vld [vmem:[#allocation4 + $0x60] sm:$0xff]  ;;  %v328_v41 = vlaneseq }
  0x43   :  { %v76_v50 = vld [vmem:[#allocation4 + $0x68] sm:$0xff]  ;;  %v101_v51 = vpack.c.bf16 %v74_v48, %v73_v47  ;;  %v77_v53 = vld [vmem:[#allocation4 + $0x70] sm:$0xff]  ;;  %v78_v54 = vld [vmem:[#allocation4 + $0x78] sm:$0xff] }
  0x44   :  { %v102_v52 = vpack.c.bf16 %v76_v50, %v75_v49  ;;  %v103_v55 = vpack.c.bf16 %v78_v54, %v77_v53  ;;  %v1095_v57 = vld [vmem:[#allocation9] ss:$0 sm:$0xff]  ;;  %v1686_v42 = vand.u32 127, %v328_v41 }
  0x45   :  { %1195 = vmatpush3.bf16.xpose.msra.mxu0 %v141_v15  ;;  %1291 = vmatpush3.bf16.msra.mxu1 %v106_v12 }
  0x46   :  { %1314 = vmatprep.subr.msk.bf16.mxu0 %vm112_vm0, %v106_v12  ;;  %1293 = vmatprep.subr.bf16.mxu1 %v107_v16 }
  0x49   :  { %1295 = vmatpush3.bf16.msra.mxu1 %v107_v16 }
  0x4a   :  { %1297 = vmatprep.subr.bf16.mxu1 %v108_v19 }
  0x4d   :  { %1197 = vmatpush3.bf16.xpose.msra.mxu0 %v144_v22  ;;  %1299 = vmatpush3.bf16.msra.mxu1 %v108_v19 }
  0x4e   :  { %1315 = vmatprep.subr.msk.bf16.mxu0 %vm112_vm0, %v107_v16  ;;  %1301 = vmatprep.subr.bf16.mxu1 %v109_v23 }
  0x51   :  { %1303 = vmatpush3.bf16.msra.mxu1 %v109_v23 }
  0x52   :  { %1305 = vmatprep.subr.bf16.mxu1 %v110_v26 }
  0x55   :  { %1199 = vmatpush3.bf16.xpose.msra.mxu0 %v147_v29  ;;  %1307 = vmatpush3.bf16.msra.mxu1 %v110_v26 }
  0x56   :  { %1316 = vmatprep.subr.msk.bf16.mxu0 %vm112_vm0, %v108_v19  ;;  %1309 = vmatprep.subr.bf16.mxu1 %v111_v30 }
  0x59   :  { %1311 = vmatpush3.bf16.msra.mxu1 %v111_v30 }
  0x5d   :  { %1201 = vmatpush3.bf16.xpose.msra.mxu0 %v150_v31 }
  0x5e   :  { %1317 = vmatprep.subr.msk.bf16.mxu0 %vm112_vm0, %v109_v23 }
  0x65   :  { %1203 = vmatpush3.bf16.xpose.msra.mxu0 %v153_v32 }
  0x66   :  { %1318 = vmatprep.subr.msk.bf16.mxu0 %vm112_vm0, %v110_v26 }
  0x6d   :  { %1205 = vmatpush3.bf16.xpose.msra.mxu0 %v156_v33 }
  0x6e   :  { %1319 = vmatprep.subr.msk.bf16.mxu0 %vm112_vm0, %v111_v30 }
  0x75   :  { %1207 = vmatpush3.bf16.xpose.msra.mxu0 %v159_v34 }
  0x7c   :  { %1209 = vmatmul.mubr.msk.bf16.vlgmr.msra.gmra.mrb[0].mxu0 %vm112_vm0, %v97_v39 }
  0x7d   :  { %1212 = vmatprep.mubr.msk.bf16.mxu0 %vm112_vm0, %v98_v40 }
  0x84   :  { %1213 = vmatmul.mubr.msk.bf16.gmra.mrb[4].mxu0 %vm112_vm0, %v99_v45 }
  0x85   :  { %1216 = vmatprep.mubr.msk.bf16.mxu0 %vm112_vm0, %v100_v46 }
  0x8c   :  { %1217 = vmatmul.mubr.msk.bf16.gmra.mrb[8].mxu0 %vm112_vm0, %v101_v51 }
  0x8d   :  { %1220 = vmatprep.mubr.msk.bf16.mxu0 %vm112_vm0, %v102_v52 }
  0x94   :  { %1221 = vmatmul.mubr.msk.bf16.gmra.mrb[12].mxu0 %vm112_vm0, %v103_v55 }
 0x14f   :  { %v1210_v56 = vpop.f32.mrb[0].mxu0 }
 0x150   :  { %v260_v58 = vmul.f32 2.0, %v1210_v56  ;;  %v195_v59 = vpop.f32.mrb[1].mxu0 }
 0x151   :  { %v258_v60 = vmul.f32 2.0, %v195_v59  ;;  %v1211_v61 = vpop.f32.mrb[2].mxu0 }
 0x152   :  { %v261_v62 = vmul.f32 2.0, %v1211_v61  ;;  %v198_v63 = vpop.f32.mrb[3].mxu0  ;;  %v1637_v0 = vsub.f32 %v1095_v57, %v260_v58 }
 0x153   :  { %v259_v1 = vmul.f32 2.0, %v198_v63  ;;  %v1639_v2 = vsub.f32 %v1095_v57, %v258_v60 }
 0x154   :  { %300 = vmin.xlane.f32.xlu1 %v1637_v0  ;;  %v1643_v3 = vsub.f32 %v1095_v57, %v261_v62 }
 0x155   :  { %296 = vmin.xlane.f32.xlu0 %v1639_v2  ;;  %v1645_v5 = vsub.f32 %v1095_v57, %v259_v1 }
 0x157   :  { %v1214_v4 = vpop.f32.mrb[4].mxu0 }
 0x158   :  { %302 = vmin.xlane.f32.xlu1 %v1643_v3  ;;  %v211_v6 = vpop.f32.mrb[5].mxu0  ;;  %v264_v10 = vmul.f32 2.0, %v1214_v4 }
 0x159   :  { %v262_v7 = vmul.f32 2.0, %v211_v6  ;;  %298 = vmin.xlane.f32.xlu0 %v1645_v5  ;;  %v1215_v8 = vpop.f32.mrb[6].mxu0 }
 0x15a   :  { %v214_v9 = vpop.f32.mrb[7].mxu0  ;;  %v265_v13 = vmul.f32 2.0, %v1215_v8  ;;  %v1655_v16 = vsub.f32 %v1095_v57, %v264_v10 }
 0x15b   :  { %v263_v11 = vmul.f32 2.0, %v214_v9  ;;  %v1649_v12 = vsub.f32 %v1095_v57, %v262_v7 }
 0x15c   :  { %v1658_v20 = vsub.f32 %v1095_v57, %v265_v13 }
 0x15d   :  { %304 = vmin.xlane.f32.xlu0 %v1649_v12  ;;  %v1652_v14 = vsub.f32 %v1095_v57, %v263_v11 }
 0x15f   :  { %306 = vmin.xlane.f32.xlu1 %v1652_v14  ;;  %v1218_v15 = vpop.f32.mrb[8].mxu0 }
 0x160   :  { %v227_v17 = vpop.f32.mrb[9].mxu0  ;;  %v268_v22 = vmul.f32 2.0, %v1218_v15 }
 0x161   :  { %v266_v18 = vmul.f32 2.0, %v227_v17  ;;  %308 = vmin.xlane.f32.xlu0 %v1655_v16  ;;  %v1219_v19 = vpop.f32.mrb[10].mxu0 }
 0x162   :  { %v230_v21 = vpop.f32.mrb[11].mxu0  ;;  %v269_v25 = vmul.f32 2.0, %v1219_v19  ;;  %v1667_v28 = vsub.f32 %v1095_v57, %v268_v22 }
 0x163   :  { %v267_v23 = vmul.f32 2.0, %v230_v21  ;;  %310 = vmin.xlane.f32.xlu1 %v1658_v20  ;;  %v1661_v24 = vsub.f32 %v1095_v57, %v266_v18 }
 0x164   :  { %v1670_v32 = vsub.f32 %v1095_v57, %v269_v25 }
 0x165   :  { %312 = vmin.xlane.f32.xlu0 %v1661_v24  ;;  %v1664_v26 = vsub.f32 %v1095_v57, %v267_v23 }
 0x167   :  { %314 = vmin.xlane.f32.xlu1 %v1664_v26  ;;  %v1222_v27 = vpop.f32.mrb[12].mxu0 }
 0x168   :  { %v243_v29 = vpop.f32.mrb[13].mxu0  ;;  %v272_v34 = vmul.f32 2.0, %v1222_v27 }
 0x169   :  { %v270_v30 = vmul.f32 2.0, %v243_v29  ;;  %316 = vmin.xlane.f32.xlu0 %v1667_v28  ;;  %v1223_v31 = vpop.f32.mrb[14].mxu0 }
 0x16a   :  { %v246_v33 = vpop.f32.mrb[15].mxu0  ;;  %v273_v37 = vmul.f32 2.0, %v1223_v31  ;;  %v1679_v39 = vsub.f32 %v1095_v57, %v272_v34 }
 0x16b   :  { %v271_v35 = vmul.f32 2.0, %v246_v33  ;;  %318 = vmin.xlane.f32.xlu1 %v1670_v32  ;;  %v1673_v36 = vsub.f32 %v1095_v57, %v270_v30 }
 0x16c   :  { %v1682_v40 = vsub.f32 %v1095_v57, %v273_v37 }
 0x16d   :  { %320 = vmin.xlane.f32.xlu0 %v1673_v36  ;;  %v1676_v38 = vsub.f32 %v1095_v57, %v271_v35 }
 0x16f   :  { %322 = vmin.xlane.f32.xlu1 %v1676_v38 }
 0x171   :  { %324 = vmin.xlane.f32.xlu0 %v1679_v39 }
 0x173   :  { %326 = vmin.xlane.f32.xlu1 %v1682_v40 }
 0x1e1   :  { %v301_v43 = vpop.xlane.xlu1 %300 }
 0x1e2   :  { %vm332_vm1 = vcmp.eq.f32.partialorder %v1637_v0, %v301_v43  ;;  %v297_v44 = vpop.xlane.xlu0 %296 }
 0x1e3   :  { %vm330_vm2 = vcmp.eq.f32.partialorder %v1639_v2, %v297_v44  ;;  %v1691_v45 = vsel %vm332_vm1, %v1686_v42, 128 }
 0x1e4   :  { %v1694_v46 = vsel %vm330_vm2, %v1686_v42, 128  ;;  %v391_v51 = vshra.s32 %v1691_v45, 16 }
 0x1e5   :  { %v303_v47 = vpop.xlane.xlu1 %302  ;;  %v363_v48 = vshra.s32 %v1694_v46, 16 }
 0x1e6   :  { %vm333_vm3 = vcmp.eq.f32.partialorder %v1643_v3, %v303_v47  ;;  %v299_v49 = vpop.xlane.xlu0 %298  ;;  %v1711_v56 = vcvt.s32.f32 %v391_v51  ;;  %v362_v47 = vand.u32 65535, %v1694_v46 }
 0x1e7   :  { %vm331_vm4 = vcmp.eq.f32.partialorder %v1645_v5, %v299_v49  ;;  %v1699_v50 = vcvt.s32.f32 %v363_v48  ;;  %v1703_v52 = vsel %vm333_vm3, %v1686_v42, 128  ;;  %v390_v48 = vand.u32 65535, %v1691_v45 }
 0x1e8   :  { %v1706_v53 = vsel %vm331_vm4, %v1686_v42, 128  ;;  %v405_v58 = vshra.s32 %v1703_v52, 16 }
 0x1e9   :  { %366 = vmin.xlane.f32.xlu0 %v1699_v50  ;;  %v377_v54 = vshra.s32 %v1706_v53, 16  ;;  %v376_v49 = vand.u32 65535, %v1706_v53  ;;  %v392_v46 = vcvt.s32.f32 %v390_v48 }
 0x1ea   :  { %v305_v55 = vpop.xlane.xlu0 %304  ;;  %v1729_v1 = vcvt.s32.f32 %v405_v58  ;;  %v404_v58 = vand.u32 65535, %v1703_v52 }
 0x1eb   :  { %vm334_vm5 = vcmp.eq.f32.partialorder %v1649_v12, %v305_v55  ;;  %v1713_v57 = vcvt.s32.f32 %v377_v54  ;;  %v364_v54 = vcvt.s32.f32 %v362_v47  ;;  %v378_v45 = vcvt.s32.f32 %v376_v49 }
 0x1ec   :  { %v1717_v59 = vsel %vm334_vm5, %v1686_v42, 128  ;;  %v307_v60 = vpop.xlane.xlu1 %306 }
 0x1ed   :  { %vm335_vm6 = vcmp.eq.f32.partialorder %v1652_v14, %v307_v60  ;;  %394 = vmin.xlane.f32.xlu0 %v1711_v56  ;;  %380 = vmin.xlane.f32.xlu1 %v1713_v57  ;;  %v419_v61 = vshra.s32 %v1717_v59, 16  ;;  %v418_v60 = vand.u32 65535, %v1717_v59 }
 0x1ee   :  { %v1724_v62 = vsel %vm335_vm6, %v1686_v42, 128  ;;  %v309_v63 = vpop.xlane.xlu0 %308 }
 0x1ef   :  { %vm336_vm7 = vcmp.eq.f32.partialorder %v1655_v16, %v309_v63  ;;  %v1727_v0 = vcvt.s32.f32 %v419_v61  ;;  %v433_v2 = vshra.s32 %v1724_v62, 16  ;;  %v432_v52 = vand.u32 65535, %v1724_v62 }
 0x1f0   :  { %v1733_v3 = vsel %vm336_vm7, %v1686_v42, 128  ;;  %v311_v4 = vpop.xlane.xlu1 %310 }
 0x1f1   :  { %vm337_vm8 = vcmp.eq.f32.partialorder %v1658_v20, %v311_v4  ;;  %422 = vmin.xlane.f32.xlu0 %v1727_v0  ;;  %408 = vmin.xlane.f32.xlu1 %v1729_v1  ;;  %v447_v5 = vshra.s32 %v1733_v3, 16  ;;  %v1745_v9 = vcvt.s32.f32 %v433_v2  ;;  %v446_v59 = vand.u32 65535, %v1733_v3 }
 0x1f2   :  { %v1740_v6 = vsel %vm337_vm8, %v1686_v42, 128  ;;  %v313_v7 = vpop.xlane.xlu0 %312 }
 0x1f3   :  { %vm338_vm9 = vcmp.eq.f32.partialorder %v1661_v24, %v313_v7  ;;  %v1743_v8 = vcvt.s32.f32 %v447_v5  ;;  %v461_v10 = vshra.s32 %v1740_v6, 16  ;;  %v420_v5 = vcvt.s32.f32 %v418_v60 }
 0x1f4   :  { %v1749_v11 = vsel %vm338_vm9, %v1686_v42, 128  ;;  %v315_v12 = vpop.xlane.xlu1 %314  ;;  %v406_v7 = vcvt.s32.f32 %v404_v58  ;;  %v460_v62 = vand.u32 65535, %v1740_v6 }
 0x1f5   :  { %vm339_vm10 = vcmp.eq.f32.partialorder %v1664_v26, %v315_v12  ;;  %450 = vmin.xlane.f32.xlu0 %v1743_v8  ;;  %436 = vmin.xlane.f32.xlu1 %v1745_v9  ;;  %v475_v13 = vshra.s32 %v1749_v11, 16  ;;  %v1761_v17 = vcvt.s32.f32 %v461_v10  ;;  %v474_v3 = vand.u32 65535, %v1749_v11 }
 0x1f6   :  { %v1756_v14 = vsel %vm339_vm10, %v1686_v42, 128  ;;  %v317_v15 = vpop.xlane.xlu0 %316 }
 0x1f7   :  { %vm340_vm11 = vcmp.eq.f32.partialorder %v1667_v28, %v317_v15  ;;  %v1759_v16 = vcvt.s32.f32 %v475_v13  ;;  %v489_v18 = vshra.s32 %v1756_v14, 16  ;;  %v448_v13 = vcvt.s32.f32 %v446_v59 }
 0x1f8   :  { %v1765_v19 = vsel %vm340_vm11, %v1686_v42, 128  ;;  %v319_v20 = vpop.xlane.xlu1 %318  ;;  %v434_v15 = vcvt.s32.f32 %v432_v52  ;;  %v488_v6 = vand.u32 65535, %v1756_v14 }
 0x1f9   :  { %vm341_vm12 = vcmp.eq.f32.partialorder %v1670_v32, %v319_v20  ;;  %478 = vmin.xlane.f32.xlu0 %v1759_v16  ;;  %464 = vmin.xlane.f32.xlu1 %v1761_v17  ;;  %v503_v21 = vshra.s32 %v1765_v19, 16  ;;  %v1777_v25 = vcvt.s32.f32 %v489_v18  ;;  %v502_v11 = vand.u32 65535, %v1765_v19 }
 0x1fa   :  { %v1772_v22 = vsel %vm341_vm12, %v1686_v42, 128  ;;  %v321_v23 = vpop.xlane.xlu0 %320 }
 0x1fb   :  { %vm342_vm13 = vcmp.eq.f32.partialorder %v1673_v36, %v321_v23  ;;  %v1775_v24 = vcvt.s32.f32 %v503_v21  ;;  %v517_v26 = vshra.s32 %v1772_v22, 16  ;;  %v476_v21 = vcvt.s32.f32 %v474_v3 }
 0x1fc   :  { %v1781_v27 = vsel %vm342_vm13, %v1686_v42, 128  ;;  %v323_v28 = vpop.xlane.xlu1 %322  ;;  %v462_v23 = vcvt.s32.f32 %v460_v62  ;;  %v516_v14 = vand.u32 65535, %v1772_v22 }
 0x1fd   :  { %vm343_vm14 = vcmp.eq.f32.partialorder %v1676_v38, %v323_v28  ;;  %506 = vmin.xlane.f32.xlu0 %v1775_v24  ;;  %492 = vmin.xlane.f32.xlu1 %v1777_v25  ;;  %v531_v29 = vshra.s32 %v1781_v27, 16  ;;  %v1793_v33 = vcvt.s32.f32 %v517_v26  ;;  %v530_v19 = vand.u32 65535, %v1781_v27 }
 0x1fe   :  { %v1788_v30 = vsel %vm343_vm14, %v1686_v42, 128  ;;  %v325_v31 = vpop.xlane.xlu0 %324 }
 0x1ff   :  { %vm344_vm15 = vcmp.eq.f32.partialorder %v1679_v39, %v325_v31  ;;  %v1791_v32 = vcvt.s32.f32 %v531_v29  ;;  %v545_v34 = vshra.s32 %v1788_v30, 16  ;;  %v504_v29 = vcvt.s32.f32 %v502_v11 }
 0x200   :  { %v1797_v35 = vsel %vm344_vm15, %v1686_v42, 128  ;;  %v327_v36 = vpop.xlane.xlu1 %326  ;;  %v490_v31 = vcvt.s32.f32 %v488_v6  ;;  %v544_v22 = vand.u32 65535, %v1788_v30 }
 0x201   :  { %vm345_vm1 = vcmp.eq.f32.partialorder %v1682_v40, %v327_v36  ;;  %534 = vmin.xlane.f32.xlu0 %v1791_v32  ;;  %520 = vmin.xlane.f32.xlu1 %v1793_v33  ;;  %v559_v37 = vshra.s32 %v1797_v35, 16  ;;  %v1808_v43 = vcvt.s32.f32 %v545_v34  ;;  %v558_v27 = vand.u32 65535, %v1797_v35 }
 0x202   :  { %v1804_v38 = vsel %vm345_vm1, %v1686_v42, 128  ;;  %v546_v49 = vcvt.s32.f32 %v544_v22 }
 0x203   :  { %v1806_v39 = vcvt.s32.f32 %v559_v37  ;;  %v573_v44 = vshra.s32 %v1804_v38, 16  ;;  %v532_v37 = vcvt.s32.f32 %v530_v19  ;;  %v572_v30 = vand.u32 65535, %v1804_v38 }
 0x204   :  { %v560_v48 = vcvt.s32.f32 %v558_v27 }
 0x205   :  { %562 = vmin.xlane.f32.xlu0 %v1806_v39  ;;  %548 = vmin.xlane.f32.xlu1 %v1808_v43  ;;  %v1813_v40 = vcvt.s32.f32 %v573_v44  ;;  %v518_v44 = vcvt.s32.f32 %v516_v14 }
 0x209   :  { %576 = vmin.xlane.f32.xlu1 %v1813_v40 }
 0x276   :  { %v1819_v51 = vpop.xlane.xlu0 %366 }
 0x277   :  { %vm368_vm2 = vcmp.eq.f32.partialorder %v1699_v50, %v1819_v51  ;;  %v373_v58 = vcvt.f32.s32 %v1819_v51 }
 0x278   :  { %v369_v55 = vsel %vm368_vm2, %v364_v54, inf }
 0x279   :  { %370 = vmin.xlane.f32.xlu0 %v369_v55  ;;  %v574_v55 = vcvt.s32.f32 %v572_v30 }
 0x27a   :  { %v1825_v61 = vpop.xlane.xlu0 %394  ;;  %v1827_v63 = vpop.xlane.xlu1 %380 }
 0x27b   :  { %vm396_vm3 = vcmp.eq.f32.partialorder %v1711_v56, %v1825_v61  ;;  %vm382_vm4 = vcmp.eq.f32.partialorder %v1713_v57, %v1827_v63  ;;  %v401_v60 = vcvt.f32.s32 %v1825_v61 }
 0x27c   :  { %v397_v53 = vsel %vm396_vm3, %v392_v46, inf  ;;  %v383_v50 = vsel %vm382_vm4, %v378_v45, inf  ;;  %vm586_vm3 = vcmask 7168  }
 0x27d   :  { %398 = vmin.xlane.f32.xlu0 %v397_v53  ;;  %384 = vmin.xlane.f32.xlu1 %v383_v50  ;;  %v374_v50 = vshll.u32 %v373_v58, 16  ;;  %v402_v52 = vshll.u32 %v401_v60, 16 }
 0x27e   :  { %v1835_v2 = vpop.xlane.xlu0 %422  ;;  %v1837_v4 = vpop.xlane.xlu1 %408 }
 0x27f   :  { %vm424_vm5 = vcmp.eq.f32.partialorder %v1727_v0, %v1835_v2  ;;  %vm410_vm6 = vcmp.eq.f32.partialorder %v1729_v1, %v1837_v4  ;;  %v415_v46 = vcvt.f32.s32 %v1837_v4 }
 0x280   :  { %v425_v56 = vsel %vm424_vm5, %v420_v5, inf  ;;  %v411_v57 = vsel %vm410_vm6, %v406_v7, inf }
 0x281   :  { %426 = vmin.xlane.f32.xlu0 %v425_v56  ;;  %412 = vmin.xlane.f32.xlu1 %v411_v57 }
 0x282   :  { %v1845_v10 = vpop.xlane.xlu0 %450  ;;  %v1847_v12 = vpop.xlane.xlu1 %436 }
 0x283   :  { %vm452_vm7 = vcmp.eq.f32.partialorder %v1743_v8, %v1845_v10  ;;  %vm438_vm8 = vcmp.eq.f32.partialorder %v1745_v9, %v1847_v12  ;;  %v457_v45 = vcvt.f32.s32 %v1845_v10  ;;  %v443_v53 = vcvt.f32.s32 %v1847_v12 }
 0x284   :  { %v453_v0 = vsel %vm452_vm7, %v448_v13, inf  ;;  %v439_v1 = vsel %vm438_vm8, %v434_v15, inf }
 0x285   :  { %454 = vmin.xlane.f32.xlu0 %v453_v0  ;;  %440 = vmin.xlane.f32.xlu1 %v439_v1  ;;  %v1917_v4 = vshll.u32 %v457_v45, 16  ;;  %v1921_v56 = vshll.u32 %v443_v53, 16 }
 0x286   :  { %v1855_v18 = vpop.xlane.xlu0 %478  ;;  %v1857_v20 = vpop.xlane.xlu1 %464 }
 0x287   :  { %vm480_vm9 = vcmp.eq.f32.partialorder %v1759_v16, %v1855_v18  ;;  %vm466_vm10 = vcmp.eq.f32.partialorder %v1761_v17, %v1857_v20  ;;  %v485_v51 = vcvt.f32.s32 %v1855_v18  ;;  %v471_v61 = vcvt.f32.s32 %v1857_v20 }
 0x288   :  { %v481_v8 = vsel %vm480_vm9, %v476_v21, inf  ;;  %v467_v9 = vsel %vm466_vm10, %v462_v23, inf  ;;  %v1518_v23 = vmov 0.0  }
 0x289   :  { %482 = vmin.xlane.f32.xlu0 %v481_v8  ;;  %468 = vmin.xlane.f32.xlu1 %v467_v9  ;;  %v1929_v12 = vshll.u32 %v485_v51, 16  ;;  %v1931_v13 = vshll.u32 %v471_v61, 16 }
 0x28a   :  { %v1865_v26 = vpop.xlane.xlu0 %506  ;;  %v1867_v28 = vpop.xlane.xlu1 %492 }
 0x28b   :  { %vm508_vm11 = vcmp.eq.f32.partialorder %v1775_v24, %v1865_v26  ;;  %vm494_vm12 = vcmp.eq.f32.partialorder %v1777_v25, %v1867_v28  ;;  %v513_v7 = vcvt.f32.s32 %v1865_v26  ;;  %v499_v57 = vcvt.f32.s32 %v1867_v28 }
 0x28c   :  { %v509_v16 = vsel %vm508_vm11, %v504_v29, inf  ;;  %v495_v17 = vsel %vm494_vm12, %v490_v31, inf }
 0x28d   :  { %510 = vmin.xlane.f32.xlu0 %v509_v16  ;;  %496 = vmin.xlane.f32.xlu1 %v495_v17  ;;  %v1934_v1 = vshll.u32 %v513_v7, 16  ;;  %v1938_v18 = vshll.u32 %v499_v57, 16 }
 0x28e   :  { %v1875_v34 = vpop.xlane.xlu0 %534  ;;  %v1877_v36 = vpop.xlane.xlu1 %520 }
 0x28f   :  { %vm536_vm13 = vcmp.eq.f32.partialorder %v1791_v32, %v1875_v34  ;;  %vm522_vm14 = vcmp.eq.f32.partialorder %v1793_v33, %v1877_v36  ;;  %v541_v62 = vcvt.f32.s32 %v1875_v34  ;;  %v527_v3 = vcvt.f32.s32 %v1877_v36 }
 0x290   :  { %v537_v24 = vsel %vm536_vm13, %v532_v37, inf  ;;  %v523_v25 = vsel %vm522_vm14, %v518_v44, inf  ;;  %v1519_v36 = vmov 1.0  }
 0x291   :  { %538 = vmin.xlane.f32.xlu0 %v537_v24  ;;  %524 = vmin.xlane.f32.xlu1 %v523_v25  ;;  %v1945_v9 = vshll.u32 %v541_v62, 16  ;;  %v1947_v14 = vshll.u32 %v527_v3, 16 }
 0x292   :  { %v1884_v47 = vpop.xlane.xlu0 %562  ;;  %v1886_v35 = vpop.xlane.xlu1 %548 }
 0x293   :  { %vm564_vm15 = vcmp.eq.f32.partialorder %v1806_v39, %v1884_v47  ;;  %vm550_vm1 = vcmp.eq.f32.partialorder %v1808_v43, %v1886_v35  ;;  %v387_v39 = vcvt.f32.s32 %v1827_v63  ;;  %v429_v43 = vcvt.f32.s32 %v1835_v2 }
 0x294   :  { %v565_v32 = vsel %vm564_vm15, %v560_v48, inf  ;;  %v551_v33 = vsel %vm550_vm1, %v546_v49, inf  ;;  %v1913_v63 = vstv %s2242_s0  ;;  %v1915_v2 = vshll.u32 %v415_v46, 16  ;;  %s1520_s0 = smov [#allocation11]  }
 0x295   :  { %566 = vmin.xlane.f32.xlu0 %v565_v32  ;;  %552 = vmin.xlane.f32.xlu1 %v551_v33  ;;  %v388_v59 = vshll.u32 %v387_v39, 16  ;;  %v1906_v5 = vshll.u32 %v429_v43, 16  ;;  %v569_v20 = vcvt.f32.s32 %v1884_v47  ;;  %v555_v21 = vcvt.f32.s32 %v1886_v35  ;;  %s1043_s18 = sshll.u32 %s1520_s0, 4  ;;  %s1044_s18 = int_to_ptr.vmem [resolvable:$true] %s1043_s18 }
 0x296   :  { %v1892_v54 = vpop.xlane.xlu1 %576  ;;  %s1415_s21 = scalar_lea.vmem %s1044_s18, 2048  ;;  %p1420_p11 = scmp.lt.s32.totalorder %s1044_s18, %s1044_s18 }
 0x297   :  { %vm578_vm2 = vcmp.eq.f32.partialorder %v1813_v40, %v1892_v54  ;;  %v1904_v40 = vshrl.u32 %v328_v41, 7  ;;  %v1959_v27 = vshll.u32 %v569_v20, 16  ;;  %v1961_v34 = vshll.u32 %v555_v21, 16  ;;  %p1416_p10 = scmp.ne.s32.totalorder %s1044_s18, %s1415_s21  ;;  %p1421_p12 = scmp.lt.s32.totalorder %s1415_s21, %s1415_s21 }
 0x298   :  { %v579_v38 = vsel %vm578_vm2, %v574_v55, inf }
 0x299   :  { %580 = vmin.xlane.f32.xlu1 %v579_v38  ;;  %v815_v41 = vadd.s32 8, %v1904_v40  ;;  %vm849_vm4 = vcmp.lt.s32.totalorder %v1904_v40, %v1913_v63  ;;  %v816_v10 = vadd.s32 16, %v1904_v40  ;;  %v817_v0 = vadd.s32 24, %v1904_v40  ;;  %p1422_p13 = por %p1421_p12, %p1420_p11 }
 0x29a   :  { %v818_v11 = vadd.s32 32, %v1904_v40  ;;  %v1943_v8 = vsel %vm849_vm4, 1.0, %v1518_v23  ;;  %v819_v31 = vadd.s32 40, %v1904_v40  ;;  %v820_v16 = vadd.s32 48, %v1904_v40 }
 0x29b   :  { %vm850_vm5 = vcmp.lt.s32.totalorder %v815_v41, %v1913_v63  ;;  %vm851_vm6 = vcmp.lt.s32.totalorder %v816_v10, %v1913_v63  ;;  %vm852_vm7 = vcmp.lt.s32.totalorder %v817_v0, %v1913_v63  ;;  %v821_v44 = vadd.s32 56, %v1904_v40  ;;  %p1423_p0 = pnand %p1422_p13, %p1416_p10 }
 0x29c   :  { %v1951_v29 = vsel %vm850_vm5, 1.0, %v1518_v23  ;;  %vm853_vm9 = vcmp.lt.s32.totalorder %v818_v11, %v1913_v63  ;;  %v1967_v37 = vsel %vm851_vm6, 1.0, %v1518_v23  ;;  %v1974_v47 = vsel %vm852_vm7, 1.0, %v1518_v23 }
 0x29d   :  { %vm854_vm10 = vcmp.lt.s32.totalorder %v819_v31, %v1913_v63  ;;  %v1978_v49 = vsel %vm853_vm9, 1.0, %v1518_v23  ;;  %vm855_vm11 = vcmp.lt.s32.totalorder %v820_v16, %v1913_v63  ;;  %v822_v32 = vadd.s32 64, %v1904_v40 }
 0x29e   :  { %v583_v38 = vcvt.f32.s32 %v1892_v54  ;;  %vm856_vm14 = vcmp.lt.s32.totalorder %v821_v44, %v1913_v63  ;;  %v825_v31 = vadd.s32 88, %v1904_v40 }
 0x29f   :  { %vm857_vm15 = vcmp.lt.s32.totalorder %v822_v32, %v1913_v63  ;;  %v2018_v57 = vsel %vm856_vm14, 1.0, %v1518_v23 }
 0x2a0   :  { %v2029_v20 = vsel %vm857_vm15, 1.0, %v1518_v23 }
 0x306   :  { %v371_v15 = vpop.xlane.xlu0 %370 }
 0x307   :  { %v372_v6 = vcvt.f32.s32 %v371_v15 }
 0x309   :  { %v375_v19 = vadd.s32 %v374_v50, %v372_v6 }
 0x30a   :  { %v399_v26 = vpop.xlane.xlu0 %398  ;;  %v385_v28 = vpop.xlane.xlu1 %384 }
 0x30b   :  { %v400_v17 = vcvt.f32.s32 %v399_v26  ;;  %v386_v22 = vcvt.f32.s32 %v385_v28  ;;  %587 = vst.msk [vmem:[#allocation11] sm:$0xff] %vm586_vm3, %v375_v19  ;;  %vm603_vm8 = vcmp.eq.s32.totalorder %v1686_v42, %v375_v19 }
 0x30c   :  { %1256 = vmatprep.mubr.msk.f32.mxu1 %vm603_vm8, %v1519_v36  ;;  %v1096_v30 = vsel %vm603_vm8, 1.0, %v1518_v23 }
 0x30d   :  { %v403_v24 = vadd.s32 %v402_v52, %v400_v17  ;;  %v389_v25 = vadd.s32 %v388_v59, %v386_v22  ;;  %v897_v58 = vmul.f32 %v1943_v8, %v1096_v30  ;;  %v1999_v52 = vsel %vm854_vm10, 1.0, %v1518_v23 }
 0x30e   :  { %v427_v35 = vpop.xlane.xlu0 %426  ;;  %v413_v48 = vpop.xlane.xlu1 %412  ;;  %v2004_v59 = vsel %vm855_vm11, 1.0, %v1518_v23  ;;  %vm860_vm10 = vcmp.lt.s32.totalorder %v825_v31, %v1913_v63 }
 0x30f   :  { %589 = vst.msk [vmem:[#allocation11 + $0x10] sm:$0xff] %vm586_vm3, %v403_v24  ;;  %588 = vst.msk [vmem:[#allocation11 + $0x8] sm:$0xff] %vm586_vm3, %v389_v25  ;;  %v428_v33 = vcvt.f32.s32 %v427_v35  ;;  %v414_v55 = vcvt.f32.s32 %v413_v48  ;;  %vm604_vm12 = vcmp.eq.s32.totalorder %v1686_v42, %v389_v25  ;;  %vm605_vm13 = vcmp.eq.s32.totalorder %v1686_v42, %v403_v24 }
 0x310   :  { %v1097_v60 = vsel %vm604_vm12, 1.0, %v1518_v23  ;;  %1257 = vmatmul.mubr.msk.f32.vlgmr.msra.gmra.mrb[0].mxu1 %vm604_vm12, %v1519_v36  ;;  %v1098_v45 = vsel %vm605_vm13, 1.0, %v1518_v23 }
 0x311   :  { %v431_v39 = vadd.s32 %v1906_v5, %v428_v33  ;;  %v417_v43 = vadd.s32 %v1915_v2, %v414_v55  ;;  %v898_v46 = vmul.f32 %v1951_v29, %v1097_v60  ;;  %1259 = vmatprep.mubr.msk.f32.mxu1 %vm605_vm13, %v1519_v36  ;;  %v823_v5 = vadd.s32 72, %v1904_v40 }
 0x312   :  { %v455_v53 = vpop.xlane.xlu0 %454  ;;  %v441_v50 = vpop.xlane.xlu1 %440  ;;  %v899_v41 = vmul.f32 %v1967_v37, %v1098_v45 }
 0x313   :  { %591 = vst.msk [vmem:[#allocation11 + $0x20] sm:$0xff] %vm586_vm3, %v431_v39  ;;  %590 = vst.msk [vmem:[#allocation11 + $0x18] sm:$0xff] %vm586_vm3, %v417_v43  ;;  %v913_v51 = vadd.f32 %v898_v46, %v897_v58  ;;  %v456_v61 = vcvt.f32.s32 %v455_v53  ;;  %v442_v2 = vcvt.f32.s32 %v441_v50  ;;  %vm606_vm1 = vcmp.eq.s32.totalorder %v1686_v42, %v417_v43 }
 0x314   :  { %v1099_v7 = vsel %vm606_vm1, 1.0, %v1518_v23  ;;  %1260 = vmatmul.mubr.msk.f32.gmra.mrb[2].mxu1 %vm606_vm1, %v1519_v36  ;;  %vm607_vm2 = vcmp.eq.s32.totalorder %v1686_v42, %v431_v39  ;;  %vm858_vm4 = vcmp.lt.s32.totalorder %v823_v5, %v1913_v63  ;;  %v827_v5 = vadd.s32 104, %v1904_v40 }
 0x315   :  { %v459_v62 = vadd.s32 %v1917_v4, %v456_v61  ;;  %v445_v3 = vadd.s32 %v1921_v56, %v442_v2  ;;  %v1100_v10 = vsel %vm607_vm2, 1.0, %v1518_v23  ;;  %1262 = vmatprep.mubr.msk.f32.mxu1 %vm607_vm2, %v1519_v36  ;;  %v900_v15 = vmul.f32 %v1974_v47, %v1099_v7 }
 0x316   :  { %v483_v0 = vpop.xlane.xlu0 %482  ;;  %v469_v6 = vpop.xlane.xlu1 %468  ;;  %v914_v11 = vadd.f32 %v913_v51, %v899_v41  ;;  %v824_v4 = vadd.s32 80, %v1904_v40  ;;  %v901_v26 = vmul.f32 %v1978_v49, %v1100_v10  ;;  %v2048_v35 = vsel %vm858_vm4, 1.0, %v1518_v23 }
 0x317   :  { %593 = vst.msk [vmem:[#allocation11 + $0x30] sm:$0xff] %vm586_vm3, %v459_v62  ;;  %592 = vst.msk [vmem:[#allocation11 + $0x28] sm:$0xff] %vm586_vm3, %v445_v3  ;;  %v484_v56 = vcvt.f32.s32 %v483_v0  ;;  %v470_v21 = vcvt.f32.s32 %v469_v6  ;;  %vm608_vm5 = vcmp.eq.s32.totalorder %v1686_v42, %v445_v3  ;;  %vm609_vm6 = vcmp.eq.s32.totalorder %v1686_v42, %v459_v62 }
 0x318   :  { %v1101_v19 = vsel %vm608_vm5, 1.0, %v1518_v23  ;;  %1263 = vmatmul.mubr.msk.f32.gmra.mrb[4].mxu1 %vm608_vm5, %v1519_v36  ;;  %v915_v28 = vadd.f32 %v914_v11, %v900_v15  ;;  %v1102_v22 = vsel %vm609_vm6, 1.0, %v1518_v23  ;;  %vm859_vm7 = vcmp.lt.s32.totalorder %v824_v4, %v1913_v63 }
 0x319   :  { %v487_v16 = vadd.s32 %v1929_v12, %v484_v56  ;;  %v473_v17 = vadd.s32 %v1931_v13, %v470_v21  ;;  %1265 = vmatprep.mubr.msk.f32.mxu1 %vm609_vm6, %v1519_v36  ;;  %v902_v44 = vmul.f32 %v1999_v52, %v1101_v19  ;;  %v826_v12 = vadd.s32 96, %v1904_v40 }
 0x31a   :  { %v511_v24 = vpop.xlane.xlu0 %510  ;;  %v497_v25 = vpop.xlane.xlu1 %496  ;;  %v916_v30 = vadd.f32 %v915_v28, %v901_v26  ;;  %v903_v33 = vmul.f32 %v2004_v59, %v1102_v22  ;;  %v2068_v50 = vsel %vm859_vm7, 1.0, %v1518_v23  ;;  %v2082_v7 = vsel %vm860_vm10, 1.0, %v1518_v23 }
 0x31b   :  { %595 = vst.msk [vmem:[#allocation11 + $0x40] sm:$0xff] %vm586_vm3, %v487_v16  ;;  %594 = vst.msk [vmem:[#allocation11 + $0x38] sm:$0xff] %vm586_vm3, %v473_v17  ;;  %v512_v13 = vcvt.f32.s32 %v511_v24  ;;  %v498_v48 = vcvt.f32.s32 %v497_v25  ;;  %vm610_vm8 = vcmp.eq.s32.totalorder %v1686_v42, %v473_v17  ;;  %vm611_vm9 = vcmp.eq.s32.totalorder %v1686_v42, %v487_v16 }
 0x31c   :  { %v1103_v32 = vsel %vm610_vm8, 1.0, %v1518_v23  ;;  %1266 = vmatmul.mubr.msk.f32.gmra.mrb[6].mxu1 %vm610_vm8, %v1519_v36  ;;  %v917_v55 = vadd.f32 %v916_v30, %v902_v44  ;;  %v1104_v39 = vsel %vm611_vm9, 1.0, %v1518_v23  ;;  %vm861_vm11 = vcmp.lt.s32.totalorder %v826_v12, %v1913_v63 }
 0x31d   :  { %v515_v58 = vadd.s32 %v1934_v1, %v512_v13  ;;  %v501_v60 = vadd.s32 %v1938_v18, %v498_v48  ;;  %1268 = vmatprep.mubr.msk.f32.mxu1 %vm611_vm9, %v1519_v36  ;;  %v904_v43 = vmul.f32 %v2018_v57, %v1103_v32  ;;  %v905_v61 = vmul.f32 %v2029_v20, %v1104_v39 }
 0x31e   :  { %v539_v46 = vpop.xlane.xlu0 %538  ;;  %v525_v45 = vpop.xlane.xlu1 %524  ;;  %v918_v53 = vadd.f32 %v917_v55, %v903_v33  ;;  %vm862_vm14 = vcmp.lt.s32.totalorder %v827_v5, %v1913_v63  ;;  %v829_v11 = vadd.s32 120, %v1904_v40  ;;  %v828_v4 = vadd.s32 112, %v1904_v40 }
 0x31f   :  { %597 = vst.msk [vmem:[#allocation11 + $0x50] sm:$0xff] %vm586_vm3, %v515_v58  ;;  %596 = vst.msk [vmem:[#allocation11 + $0x48] sm:$0xff] %vm586_vm3, %v501_v60  ;;  %v540_v1 = vcvt.f32.s32 %v539_v46  ;;  %v526_v18 = vcvt.f32.s32 %v525_v45  ;;  %vm612_vm12 = vcmp.eq.s32.totalorder %v1686_v42, %v501_v60  ;;  %vm613_vm13 = vcmp.eq.s32.totalorder %v1686_v42, %v515_v58 }
 0x320   :  { %v1105_v51 = vsel %vm612_vm12, 1.0, %v1518_v23  ;;  %1269 = vmatmul.mubr.msk.f32.gmra.mrb[8].mxu1 %vm612_vm12, %v1519_v36  ;;  %v919_v2 = vadd.f32 %v918_v53, %v904_v43  ;;  %v1106_v3 = vsel %vm613_vm13, 1.0, %v1518_v23  ;;  %v2102_v40 = vsel %vm861_vm11, 1.0, %v1518_v23 }
 0x321   :  { %v543_v41 = vadd.s32 %v1945_v9, %v540_v1  ;;  %v529_v62 = vadd.s32 %v1947_v14, %v526_v18  ;;  %1271 = vmatprep.mubr.msk.f32.mxu1 %vm613_vm13, %v1519_v36  ;;  %v906_v10 = vmul.f32 %v2048_v35, %v1105_v51  ;;  %v907_v21 = vmul.f32 %v2068_v50, %v1106_v3  ;;  %v1334_v51 = vld [vmem:[#allocation4] sm:$0xff] }
 0x322   :  { %v567_v15 = vpop.xlane.xlu0 %566  ;;  %v553_v0 = vpop.xlane.xlu1 %552  ;;  %v920_v6 = vadd.f32 %v919_v2, %v905_v61  ;;  %v584_v17 = vshll.u32 %v583_v38, 16  ;;  %v2114_v24 = vsel %vm862_vm14, 1.0, %v1518_v23  ;;  %vm863_vm2 = vcmp.lt.s32.totalorder %v828_v4, %v1913_v63 }
 0x323   :  { %599 = vst.msk [vmem:[#allocation11 + $0x60] sm:$0xff] %vm586_vm3, %v543_v41  ;;  %598 = vst.msk [vmem:[#allocation11 + $0x58] sm:$0xff] %vm586_vm3, %v529_v62  ;;  %v568_v9 = vcvt.f32.s32 %v567_v15  ;;  %v554_v14 = vcvt.f32.s32 %v553_v0  ;;  %vm614_vm15 = vcmp.eq.s32.totalorder %v1686_v42, %v529_v62  ;;  %vm615_vm1 = vcmp.eq.s32.totalorder %v1686_v42, %v543_v41 }
 0x324   :  { %v1107_v56 = vsel %vm614_vm15, 1.0, %v1518_v23  ;;  %1272 = vmatmul.mubr.msk.f32.gmra.mrb[10].mxu1 %vm614_vm15, %v1519_v36  ;;  %v921_v19 = vadd.f32 %v920_v6, %v906_v10  ;;  %v1108_v31 = vsel %vm615_vm1, 1.0, %v1518_v23  ;;  %vm864_vm6 = vcmp.lt.s32.totalorder %v829_v11, %v1913_v63  ;;  %v1335_v10 = vld [vmem:[#allocation4 + $0x18] sm:$0xff]  ;;  %v1336_v11 = vld [vmem:[#allocation4 + $0x10] sm:$0xff] }
 0x325   :  { %v571_v26 = vadd.s32 %v1959_v27, %v568_v9  ;;  %v557_v28 = vadd.s32 %v1961_v34, %v554_v14  ;;  %1274 = vmatprep.mubr.msk.f32.mxu1 %vm615_vm1, %v1519_v36  ;;  %v908_v16 = vmul.f32 %v2082_v7, %v1107_v56  ;;  %v909_v34 = vmul.f32 %v2102_v40, %v1108_v31 }
 0x326   :  { %v581_v22 = vpop.xlane.xlu1 %580  ;;  %v922_v44 = vadd.f32 %v921_v19, %v907_v21  ;;  %v2129_v13 = vsel %vm863_vm2, 1.0, %v1518_v23  ;;  %v2132_v63 = vsel %vm864_vm6, 1.0, %v1518_v23  ;;  %v1337_v19 = vld [vmem:[#allocation4 + $0x28] sm:$0xff] }
 0x327   :  { %601 = vst.msk [vmem:[#allocation11 + $0x70] sm:$0xff] %vm586_vm3, %v571_v26  ;;  %600 = vst.msk [vmem:[#allocation11 + $0x68] sm:$0xff] %vm586_vm3, %v557_v28  ;;  %v582_v27 = vcvt.f32.s32 %v581_v22  ;;  %vm616_vm4 = vcmp.eq.s32.totalorder %v1686_v42, %v557_v28  ;;  %vm617_vm5 = vcmp.eq.s32.totalorder %v1686_v42, %v571_v26 }
 0x328   :  { %v1109_v54 = vsel %vm616_vm4, 1.0, %v1518_v23  ;;  %1275 = vmatmul.mubr.msk.f32.gmra.mrb[12].mxu1 %vm616_vm4, %v1519_v36  ;;  %v923_v38 = vadd.f32 %v922_v44, %v908_v16  ;;  %v1110_v30 = vsel %vm617_vm5, 1.0, %v1518_v23 }
 0x329   :  { %v585_v25 = vadd.s32 %v584_v17, %v582_v27  ;;  %1277 = vmatprep.mubr.msk.f32.mxu1 %vm617_vm5, %v1519_v36  ;;  %v910_v12 = vmul.f32 %v2114_v24, %v1109_v54  ;;  %v911_v33 = vmul.f32 %v2129_v13, %v1110_v30  ;;  %v1338_v17 = vld [vmem:[#allocation4 + $0x20] sm:$0xff] }
 0x32a   :  { %v924_v48 = vadd.f32 %v923_v38, %v909_v34  ;;  %v1339_v34 = vld [vmem:[#allocation4 + $0x38] sm:$0xff] }
 0x32b   :  { %602 = vst.msk [vmem:[#allocation11 + $0x78] sm:$0xff] %vm586_vm3, %v585_v25  ;;  %vm618_vm7 = vcmp.eq.s32.totalorder %v1686_v42, %v585_v25  ;;  %v1333_v42 = vld [vmem:[#allocation4 + $0x8] sm:$0xff] }
 0x32c   :  { %v1111_v32 = vsel %vm618_vm7, 1.0, %v1518_v23  ;;  %1278 = vmatmul.mubr.msk.f32.gmra.mrb[14].mxu1 %vm618_vm7, %v1519_v36  ;;  %v925_v55 = vadd.f32 %v924_v48, %v910_v12 }
 0x32d   :  { %v912_v58 = vmul.f32 %v2132_v63, %v1111_v32  ;;  %v1340_v32 = vld [vmem:[#allocation4 + $0x30] sm:$0xff] }
 0x32e   :  { %v926_v60 = vadd.f32 %v925_v55, %v911_v33 }
 0x330   :  { %v927_v39 = vadd.f32 %v926_v60, %v912_v58 }
 0x332   :  { %v928_v43 = vrot.slane %v927_v39, 4 }
 0x334   :  { %v929_v46 = vadd.f32 %v928_v43, %v927_v39  ;;  %v1341_v43 = vld [vmem:[#allocation4 + $0x48] sm:$0xff] }
 0x336   :  { %v930_v45 = vrot.slane %v929_v46, 2 }
 0x338   :  { %v931_v53 = vadd.f32 %v930_v45, %v929_v46 }
 0x33a   :  { %v932_v5 = vrot.slane %v931_v53, 1 }
 0x33c   :  { %v933_v1 = vadd.f32 %v932_v5, %v931_v53 }
 0x33e   :  { %934 = vst [vmem:[#allocation13] sm:$0x1] %v933_v1 }
 0x3e3   :  { %v1258_v18 = vpop.f32.mrb[0].mxu1 }
 0x3e4   :  { %797 = vst.msk [vmem:[#allocation10 + $0x8] sm:$0xff] %vm112_vm0, %v1258_v18  ;;  %v936_v23 = vsub.f32 %v1258_v18, %v1333_v42  ;;  %v717_v36 = vpop.f32.mrb[1].mxu1  ;;  %v1342_v18 = vld [vmem:[#allocation4 + $0x40] sm:$0xff] }
 0x3e5   :  { %796 = vst.msk [vmem:[#allocation10] sm:$0xff] %vm112_vm0, %v717_v36  ;;  %v935_v61 = vsub.f32 %v717_v36, %v1334_v51 }
 0x3e6   :  { %v952_v2 = vmul.f32 %v1951_v29, %v936_v23 }
 0x3e7   :  { %v951_v41 = vmul.f32 %v1943_v8, %v935_v61  ;;  %v1261_v62 = vpop.f32.mrb[2].mxu1 }
 0x3e8   :  { %v968_v3 = vmul.f32 %v952_v2, %v952_v2  ;;  %799 = vst.msk [vmem:[#allocation10 + $0x18] sm:$0xff] %vm112_vm0, %v1261_v62  ;;  %v938_v15 = vsub.f32 %v1261_v62, %v1335_v10  ;;  %v727_v0 = vpop.f32.mrb[3].mxu1  ;;  %v1343_v2 = vld [vmem:[#allocation4 + $0x58] sm:$0xff] }
 0x3e9   :  { %v967_v6 = vmul.f32 %v951_v41, %v951_v41  ;;  %798 = vst.msk [vmem:[#allocation10 + $0x10] sm:$0xff] %vm112_vm0, %v727_v0  ;;  %v937_v4 = vsub.f32 %v727_v0, %v1336_v11  ;;  %v1344_v0 = vld [vmem:[#allocation4 + $0x50] sm:$0xff] }
 0x3ea   :  { %v984_v9 = vsel %vm112_vm0, %v968_v3, 0.0  ;;  %v954_v14 = vmul.f32 %v1974_v47, %v938_v15 }
 0x3eb   :  { %v983_v29 = vsel %vm112_vm0, %v967_v6, 0.0  ;;  %v953_v8 = vmul.f32 %v1967_v37, %v937_v4  ;;  %v1264_v56 = vpop.f32.mrb[4].mxu1 }
 0x3ec   :  { %v985_v21 = vadd.f32 %v984_v9, %v983_v29  ;;  %801 = vst.msk [vmem:[#allocation10 + $0x28] sm:$0xff] %vm112_vm0, %v1264_v56  ;;  %v940_v26 = vsub.f32 %v1264_v56, %v1337_v19  ;;  %v737_v28 = vpop.f32.mrb[5].mxu1  ;;  %v970_v31 = vmul.f32 %v954_v14, %v954_v14  ;;  %v1345_v29 = vld [vmem:[#allocation4 + $0x68] sm:$0xff] }
 0x3ed   :  { %v969_v16 = vmul.f32 %v953_v8, %v953_v8  ;;  %800 = vst.msk [vmem:[#allocation10 + $0x20] sm:$0xff] %vm112_vm0, %v737_v28  ;;  %v939_v22 = vsub.f32 %v737_v28, %v1338_v17  ;;  %v1346_v28 = vld [vmem:[#allocation4 + $0x60] sm:$0xff] }
 0x3ee   :  { %v956_v44 = vmul.f32 %v1999_v52, %v940_v26  ;;  %v988_v30 = vsel %vm112_vm0, %v970_v31, 0.0 }
 0x3ef   :  { %v986_v47 = vsel %vm112_vm0, %v969_v16, 0.0  ;;  %v955_v27 = vmul.f32 %v1978_v49, %v939_v22  ;;  %v1267_v37 = vpop.f32.mrb[6].mxu1 }
 0x3f0   :  { %v987_v54 = vadd.f32 %v986_v47, %v985_v21  ;;  %803 = vst.msk [vmem:[#allocation10 + $0x38] sm:$0xff] %vm112_vm0, %v1267_v37  ;;  %v942_v38 = vsub.f32 %v1267_v37, %v1339_v34  ;;  %v747_v25 = vpop.f32.mrb[7].mxu1  ;;  %v972_v12 = vmul.f32 %v956_v44, %v956_v44  ;;  %v1347_v47 = vld [vmem:[#allocation4 + $0x78] sm:$0xff] }
 0x3f1   :  { %v971_v48 = vmul.f32 %v955_v27, %v955_v27  ;;  %802 = vst.msk [vmem:[#allocation10 + $0x30] sm:$0xff] %vm112_vm0, %v747_v25  ;;  %v941_v33 = vsub.f32 %v747_v25, %v1340_v32  ;;  %v1348_v25 = vld [vmem:[#allocation4 + $0x70] sm:$0xff] }
 0x3f2   :  { %v989_v52 = vadd.f32 %v988_v30, %v987_v54  ;;  %v958_v55 = vmul.f32 %v2018_v57, %v942_v38  ;;  %v992_v53 = vsel %vm112_vm0, %v972_v12, 0.0 }
 0x3f3   :  { %v990_v49 = vsel %vm112_vm0, %v971_v48, 0.0  ;;  %v957_v58 = vmul.f32 %v2004_v59, %v941_v33  ;;  %v1270_v60 = vpop.f32.mrb[8].mxu1 }
 0x3f4   :  { %v991_v39 = vadd.f32 %v990_v49, %v989_v52  ;;  %805 = vst.msk [vmem:[#allocation10 + $0x48] sm:$0xff] %vm112_vm0, %v1270_v60  ;;  %v944_v46 = vsub.f32 %v1270_v60, %v1341_v43  ;;  %v757_v45 = vpop.f32.mrb[9].mxu1  ;;  %v974_v5 = vmul.f32 %v958_v55, %v958_v55 }
 0x3f5   :  { %v973_v1 = vmul.f32 %v957_v58, %v957_v58  ;;  %804 = vst.msk [vmem:[#allocation10 + $0x40] sm:$0xff] %vm112_vm0, %v757_v45  ;;  %v943_v42 = vsub.f32 %v757_v45, %v1342_v18 }
 0x3f6   :  { %v993_v57 = vadd.f32 %v992_v53, %v991_v39  ;;  %v960_v23 = vmul.f32 %v2048_v35, %v944_v46  ;;  %v996_v3 = vsel %vm112_vm0, %v974_v5, 0.0 }
 0x3f7   :  { %v994_v59 = vsel %vm112_vm0, %v973_v1, 0.0  ;;  %v959_v36 = vmul.f32 %v2029_v20, %v943_v42  ;;  %v1273_v51 = vpop.f32.mrb[10].mxu1 }
 0x3f8   :  { %v995_v61 = vadd.f32 %v994_v59, %v993_v57  ;;  %807 = vst.msk [vmem:[#allocation10 + $0x58] sm:$0xff] %vm112_vm0, %v1273_v51  ;;  %v946_v41 = vsub.f32 %v1273_v51, %v1343_v2  ;;  %v767_v62 = vpop.f32.mrb[11].mxu1  ;;  %v976_v10 = vmul.f32 %v960_v23, %v960_v23 }
 0x3f9   :  { %v975_v15 = vmul.f32 %v959_v36, %v959_v36  ;;  %806 = vst.msk [vmem:[#allocation10 + $0x50] sm:$0xff] %vm112_vm0, %v767_v62  ;;  %v945_v6 = vsub.f32 %v767_v62, %v1344_v0 }
 0x3fa   :  { %v997_v35 = vadd.f32 %v996_v3, %v995_v61  ;;  %v962_v11 = vmul.f32 %v2082_v7, %v946_v41  ;;  %v1000_v21 = vsel %vm112_vm0, %v976_v10, 0.0 }
 0x3fb   :  { %v998_v20 = vsel %vm112_vm0, %v975_v15, 0.0  ;;  %v961_v4 = vmul.f32 %v2068_v50, %v945_v6  ;;  %v1276_v9 = vpop.f32.mrb[12].mxu1 }
 0x3fc   :  { %v999_v14 = vadd.f32 %v998_v20, %v997_v35  ;;  %809 = vst.msk [vmem:[#allocation10 + $0x68] sm:$0xff] %vm112_vm0, %v1276_v9  ;;  %v948_v8 = vsub.f32 %v1276_v9, %v1345_v29  ;;  %v777_v56 = vpop.f32.mrb[13].mxu1  ;;  %v978_v19 = vmul.f32 %v962_v11, %v962_v11 }
 0x3fd   :  { %v977_v26 = vmul.f32 %v961_v4, %v961_v4  ;;  %808 = vst.msk [vmem:[#allocation10 + $0x60] sm:$0xff] %vm112_vm0, %v777_v56  ;;  %v947_v31 = vsub.f32 %v777_v56, %v1346_v28 }
 0x3fe   :  { %v1001_v7 = vadd.f32 %v1000_v21, %v999_v14  ;;  %v964_v16 = vmul.f32 %v2114_v24, %v948_v8  ;;  %v1004_v54 = vsel %vm112_vm0, %v978_v19, 0.0 }
 0x3ff   :  { %v1002_v50 = vsel %vm112_vm0, %v977_v26, 0.0  ;;  %v963_v17 = vmul.f32 %v2102_v40, %v947_v31  ;;  %v1279_v22 = vpop.f32.mrb[14].mxu1 }
 0x400   :  { %v1003_v44 = vadd.f32 %v1002_v50, %v1001_v7  ;;  %811 = vst.msk [vmem:[#allocation10 + $0x78] sm:$0xff] %vm112_vm0, %v1279_v22  ;;  %v950_v27 = vsub.f32 %v1279_v22, %v1347_v47  ;;  %v787_v37 = vpop.f32.mrb[15].mxu1  ;;  %v980_v34 = vmul.f32 %v964_v16, %v964_v16 }
 0x401   :  { %v979_v38 = vmul.f32 %v963_v17, %v963_v17  ;;  %810 = vst.msk [vmem:[#allocation10 + $0x70] sm:$0xff] %vm112_vm0, %v787_v37  ;;  %v949_v30 = vsub.f32 %v787_v37, %v1348_v25 }
 0x402   :  { %v1005_v24 = vadd.f32 %v1004_v54, %v1003_v44  ;;  %v966_v12 = vmul.f32 %v2132_v63, %v950_v27  ;;  %v1008_v33 = vsel %vm112_vm0, %v980_v34, 0.0 }
 0x403   :  { %v1006_v40 = vsel %vm112_vm0, %v979_v38, 0.0  ;;  %v965_v48 = vmul.f32 %v2129_v13, %v949_v30 }
 0x404   :  { %v1007_v32 = vadd.f32 %v1006_v40, %v1005_v24  ;;  %v982_v52 = vmul.f32 %v966_v12, %v966_v12 }
 0x405   :  { %v981_v55 = vmul.f32 %v965_v48, %v965_v48 }
 0x406   :  { %v1009_v49 = vadd.f32 %v1008_v33, %v1007_v32  ;;  %v1012_v39 = vsel %vm112_vm0, %v982_v52, 0.0 }
 0x407   :  { %v1010_v58 = vsel %vm112_vm0, %v981_v55, 0.0 }
 0x408   :  { %v1011_v60 = vadd.f32 %v1010_v58, %v1009_v49 }
 0x40a   :  { %v1013_v43 = vadd.f32 %v1012_v39, %v1011_v60 }
 0x40c   :  { %1014 = vadd.xlane.f32.xlu0 %v1013_v43 }
 0x40d   :  { %1426 = shalt.err (!%p1423_p0)
}
 0x40e   :  { %s1427_s24 = scalar_lea.hbm %s2247_s5, 2048 }
 0x40f   :  { %p1428_p1 = scmp.ne.s32.totalorder %s2247_s5, %s1427_s24  ;;  %p1431_p2 = scmp.lt.u32.totalorder %s1427_s24, %s2247_s5 }
 0x411   :  { %p1433_p3 = pnand %p1431_p2, %p1428_p1 }
 0x413   :  { %1436 = shalt.err (!%p1433_p3)
}
 0x414   :  { %1049 = dma.vmem_to_hbm [thread:$0]  %s1044_s18, 2048, %s2247_s5, [#allocation12], %s1515_s13, %s1515_s13, %s1516_s14  }
 0x415   :  { %s1437_s8 = scalar_lea.vmem %s1032_s20, 2048  ;;  %p1442_p5 = scmp.lt.s32.totalorder %s1032_s20, %s1032_s20 }
 0x416   :  { %p1438_p4 = scmp.ne.s32.totalorder %s1032_s20, %s1437_s8  ;;  %p1443_p6 = scmp.lt.s32.totalorder %s1437_s8, %s1437_s8 }
 0x418   :  { %p1444_p7 = por %p1443_p6, %p1442_p5 }
 0x41a   :  { %p1445_p8 = pnand %p1444_p7, %p1438_p4 }
 0x41c   :  { %1448 = shalt.err (!%p1445_p8)
}
 0x41d   :  { %s1449_s11 = scalar_lea.hbm %s2246_s4, 2048 }
 0x41e   :  { %p1450_p9 = scmp.ne.s32.totalorder %s2246_s4, %s1449_s11  ;;  %p1453_p10 = scmp.lt.u32.totalorder %s1449_s11, %s2246_s4 }
 0x420   :  { %p1455_p11 = pnand %p1453_p10, %p1450_p9 }
 0x422   :  { %1458 = shalt.err (!%p1455_p11)
}
 0x423   :  { %1037 = dma.vmem_to_hbm [thread:$0]  %s1032_s20, 2048, %s2246_s4, [#allocation6], %s1515_s13, %s1515_s13, %s1516_s14  }
 0x424   :  { %s1522_s3 = smov [#allocation13]  }
 0x425   :  { %s1056_s17 = sshll.u32 %s1522_s3, 4  ;;  %s1057_s17 = int_to_ptr.vmem [resolvable:$true] %s1056_s17 }
 0x426   :  { %s1459_s0 = scalar_lea.vmem %s1057_s17, 16  ;;  %s1463_s18 = scalar_lea.vmem %s1057_s17, 32 }
 0x427   :  { %p1460_p12 = scmp.ne.s32.totalorder %s1057_s17, %s1459_s0  ;;  %p1464_p13 = scmp.lt.s32.totalorder %s1057_s17, %s1057_s17 }
 0x428   :  { %p1465_p0 = scmp.lt.s32.totalorder %s1463_s18, %s1459_s0 }
 0x42a   :  { %p1466_p1 = por %p1465_p0, %p1464_p13 }
 0x42c   :  { %p1467_p2 = pnand %p1466_p1, %p1460_p12 }
 0x42e   :  { %1470 = shalt.err (!%p1467_p2)
}
 0x42f   :  { %s1471_s22 = scalar_lea.hbm %s2248_s6, 16 }
 0x430   :  { %p1472_p3 = scmp.ne.s32.totalorder %s2248_s6, %s1471_s22  ;;  %p1475_p4 = scmp.lt.u32.totalorder %s1471_s22, %s2248_s6 }
 0x432   :  { %p1477_p5 = pnand %p1475_p4, %p1472_p3 }
 0x434   :  { %1480 = shalt.err (!%p1477_p5)
}
 0x435   :  { %1059 = dma.vmem_to_hbm [thread:$0]  %s1057_s17, 16, %s2248_s6, [#allocation12]   ;;  %vm1024_vm0 = vcmask 0  }
 0x436   :  { %s1523_s2 = smov [#allocation14]  }
 0x437   :  { %s1066_s25 = sshll.u32 %s1523_s2, 4  ;;  %s1067_s25 = int_to_ptr.vmem [resolvable:$true] %s1066_s25 }
 0x438   :  { %s1481_s28 = scalar_lea.vmem %s1067_s25, 16  ;;  %s1485_s29 = scalar_lea.vmem %s1067_s25, 32 }
 0x439   :  { %p1482_p6 = scmp.ne.s32.totalorder %s1067_s25, %s1481_s28  ;;  %p1486_p7 = scmp.lt.s32.totalorder %s1067_s25, %s1067_s25 }
 0x43a   :  { %p1487_p8 = scmp.lt.s32.totalorder %s1485_s29, %s1481_s28 }
 0x43c   :  { %p1488_p9 = por %p1487_p8, %p1486_p7 }
 0x43e   :  { %p1489_p10 = pnand %p1488_p9, %p1482_p6 }
 0x499   :  { %v1015_v13 = vpop.xlane.xlu0 %1014 }
 0x49a   :  { %v1016_v63 = vrot.slane %v1015_v13, 4 }
 0x49c   :  { %v1017_v46 = vadd.f32 %v1016_v63, %v1015_v13 }
 0x49e   :  { %v1018_v45 = vrot.slane %v1017_v46, 2 }
 0x4a0   :  { %v1019_v53 = vadd.f32 %v1018_v45, %v1017_v46 }
 0x4a2   :  { %v1020_v5 = vrot.slane %v1019_v53, 1 }
 0x4a4   :  { %v1021_v1 = vadd.f32 %v1020_v5, %v1019_v53 }
 0x4a6   :  { %1320 = vpush %v1021_v1 }
 0x4d7   :  { %s1321_s26 = spop %1320 }
 0x4d8   :  { %v1023_v18 = vstv %s1321_s26 }
 0x4d9   :  { %1025 = vst.msk [vmem:[#allocation14] sm:$0x1] %vm1024_vm0, %v1023_v18 }
 0x4da   :  { %1492 = shalt.err (!%p1489_p10)
}
 0x4db   :  { %s1493_s8 = scalar_lea.hbm %s2249_s7, 16 }
 0x4dc   :  { %p1494_p11 = scmp.ne.s32.totalorder %s2249_s7, %s1493_s8  ;;  %p1497_p12 = scmp.lt.u32.totalorder %s1493_s8, %s2249_s7 }
 0x4de   :  { %p1499_p13 = pnand %p1497_p12, %p1494_p11 }
 0x4e0   :  { %1502 = shalt.err (!%p1499_p13)
}
 0x4e1   :  { %1069 = dma.vmem_to_hbm [thread:$0]  %s1067_s25, 16, %s2249_s7, [#allocation15]  }
 0x4e2   :  { %1507 = dma.done.wait [#allocation6], 2048  }
 0x4e3   :  { %1508 = vsyncadd [#allocation6], 4294965248 }
 0x4e4   :  { %1509 = dma.done.wait [#allocation12], 2064  }
 0x4e5   :  { %1510 = vsyncadd [#allocation12], 4294965232 }
 0x4e6   :  { %1511 = dma.done.wait [#allocation15], 16  }
 0x4e7   :  { %1512 = vsyncadd [#allocation15], 4294967280 }
 0x4e8   :  { %1082 = vsyncpa [#allocation5], 1 }
 0x4e9   :  { %1083 = vsyncpa [#allocation8], 1 }
 0x4ea   :  { %1084 = vsyncpa [#allocation6], 1 }
 0x4eb   :  { %1085 = vsyncpa [#allocation12], 1 }
 0x4ec   :  { %1086 = vsyncpa [#allocation15], 1 }

</bundles_post_ra>
